<compile_context>
chip_gen: v7x
topology: tpu7x:2x2x1
jax: 0.10.0
libtpu: 0.0.40
codegen_flags: <defaults>
</compile_context>

<pallas_src>
import functools
import math

import jax
import jax.numpy as jnp
from jax.experimental import pallas as pl
from jax.experimental.pallas import tpu as pltpu


# ----------------------------------------------------------------------------
# Pallas kernel: double-buffered row gather + sqrt(d_model) scale
# ----------------------------------------------------------------------------
def _embed_kernel(ids_ref, table_hbm, out_ref, buf, sems, *, tb, scale):
    # ids_ref   : SMEM (T_pad,) int32            (scalar-prefetched token ids)
    # table_hbm : HBM  (vocab, D)                (raw ref, manual DMA gather)
    # out_ref   : VMEM (TB, D) output block      (auto-pipelined writeback)
    # buf       : VMEM (2, TB, D) gather scratch (slot g%2 holds block g)
    # sems      : DMA  (2, TB) semaphores        (one per in-flight row DMA)
    g = pl.program_id(0)
    ng = pl.num_programs(0)

    def issue_block(block_idx, slot):
        base = block_idx * tb
        for j in range(tb):                      # static unroll: TB row DMAs
            tok = ids_ref[base + j]              # SMEM scalar read (pre-wait)
            pltpu.make_async_copy(
                table_hbm.at[pl.ds(tok, 1), :],  # one (1, D) row from HBM
                buf.at[slot, pl.ds(j, 1), :],    # into row j of slot
                sems.at[slot, j],
            ).start()

    # Prime the pipeline: block 0 into slot 0 on the first step.
    @pl.when(g == 0)
    def _():
        issue_block(0, 0)

    # Prefetch the NEXT block into the other slot BEFORE any wait, so its
    # row DMAs overlap this block's wait + scale + writeback.
    @pl.when(g + 1 < ng)
    def _():
        issue_block(g + 1, (g + 1) % 2)

    # Wait for this block's rows, then scale in f32 and store the whole
    # lane-dense (TB, D) block.
    slot = g % 2
    for j in range(tb):
        pltpu.make_async_copy(
            table_hbm.at[pl.ds(0, 1), :],        # same-shape descriptor; wait
            buf.at[slot, pl.ds(j, 1), :],        # only checks the semaphore
            sems.at[slot, j],
        ).wait()

    out_ref[...] = (buf[slot].astype(jnp.float32) * scale).astype(out_ref.dtype)


# ----------------------------------------------------------------------------
# Wrapper
# ----------------------------------------------------------------------------
def embeddings_forward(ids, table, *, tokens_per_block=256):
    """ids: (B, S) integer token ids; table: (vocab, d_model).

    Returns (B, S, d_model) = table[ids] * sqrt(d_model).
    """
    B, S = ids.shape
    V, D = table.shape
    T = B * S
    itemsize = jnp.dtype(table.dtype).itemsize

    # Token block: multiple of 8 (f32 sublane), no bigger than the padded
    # token count, capped so a single (TB, D) block stays <= 8 MiB (keeps the
    # 2x gather buf + 2x out block well under v7x's 64 MiB VMEM).
    tb = max(8, min(int(tokens_per_block), pl.cdiv(T, 8) * 8))
    tb = pl.cdiv(tb, 8) * 8
    while tb > 8 and tb * D * itemsize > 8 * 1024 * 1024:
        tb = max(8, (tb // 2 // 8) * 8)
    T_pad = pl.cdiv(T, tb) * tb

    # Clamp ids (no OOB HBM row DMAs) and pad to a whole number of blocks.
    flat = jnp.clip(ids.reshape(T).astype(jnp.int32), 0, V - 1)
    if T_pad != T:
        flat = jnp.concatenate([flat, jnp.zeros((T_pad - T,), jnp.int32)])

    scale = math.sqrt(D)

    block_bytes = tb * D * itemsize
    # 2x gather buffer + double-buffered output block + headroom.
    vmem_limit = int(min(64 * 1024 * 1024,
                         max(32 * 1024 * 1024, 6 * block_bytes)))

    cost = pl.CostEstimate(
        flops=T_pad * D,                                   # the scale multiply
        transcendentals=0,
        bytes_accessed=2 * T_pad * D * itemsize + 4 * T_pad,
    )

    out_flat = pl.pallas_call(
        functools.partial(_embed_kernel, tb=tb, scale=scale),
        out_shape=jax.ShapeDtypeStruct((T_pad, D), table.dtype),
        grid_spec=pltpu.PrefetchScalarGridSpec(
            num_scalar_prefetch=1,                         # flat ids -> SMEM
            grid=(T_pad // tb,),
            in_specs=[pl.BlockSpec(memory_space=pl.ANY)],  # table stays in HBM
            out_specs=pl.BlockSpec((tb, D), lambda g, ids: (g, 0)),
            scratch_shapes=[
                pltpu.VMEM((2, tb, D), table.dtype),       # double-buffered gather
                pltpu.SemaphoreType.DMA((2, tb)),
            ],
        ),
        compiler_params=pltpu.CompilerParams(
            # Cross-step prefetch carries state across grid steps -> sequential.
            dimension_semantics=("arbitrary",),
            vmem_limit_bytes=vmem_limit,
        ),
        cost_estimate=cost,
    )(flat, table)

    return out_flat[:T].reshape(B, S, D)


# ----------------------------------------------------------------------------
if __name__ == "__main__":
    B, S, D_MODEL, VOCAB = 2, 8, 128, 1000

    root = jax.random.PRNGKey(0)
    k_table, k_ids = jax.random.split(root)

    # nn.Embedding weight ~ N(0, 1) by default.
    table = jax.random.normal(k_table, (VOCAB, D_MODEL), jnp.float32)
    ids = jax.random.randint(k_ids, (B, S), 0, VOCAB, jnp.int32)

    out = embeddings_forward(ids, table)
    out = jax.block_until_ready(out)

    # Reference: lut(x) * sqrt(d_model)
    ref = jnp.take(table, ids, axis=0) * math.sqrt(D_MODEL)

    assert out.shape == (B, S, D_MODEL)
    assert bool(jnp.all(jnp.isfinite(out)))
    assert bool(jnp.allclose(out, ref, atol=1e-5, rtol=1e-5))
    print("KERNEL_OK")
</pallas_src>

<mosaic_0001>
module attributes {stable_mosaic.version = 11 : i64} {
  func.func @_embed_kernel(%arg0: i32, %arg1: memref<16xi32, #tpu.memory_space<smem>>, %arg2: memref<1000x128xf32, #tpu.memory_space<any>>, %arg3: memref<16x128xf32, #tpu.memory_space<vmem>>, %arg4: memref<2x16x128xf32, #tpu.memory_space<vmem>>, %arg5: memref<2x16x!tpu.dma_semaphore, #tpu.memory_space<semaphore_mem>>) attributes {dimension_semantics = [#tpu.dimension_semantics<arbitrary>], iteration_bounds = array<i64: 1>, scalar_prefetch = 1 : i64, scratch_operands = 2 : i64, tpu.core_type = #tpu.core_type<tc>, window_params = [{}, {transform_indices = @transform_1, window_bounds = array<i64: 16, 128>}]} {
    %c0_i32 = arith.constant 0 : i32
    %0 = arith.cmpi eq, %arg0, %c0_i32 : i32
    %1 = arith.extui %0 : i1 to i32
    %c0_i32_0 = arith.constant 0 : i32
    %2 = arith.cmpi ne, %1, %c0_i32_0 : i32
    scf.if %2 {
      %c0_78 = arith.constant 0 : index
      %103 = memref.load %arg1[%c0_78] : memref<16xi32, #tpu.memory_space<smem>>
      %c0_i32_79 = arith.constant 0 : i32
      %c0_i32_80 = arith.constant 0 : i32
      %c0_i32_81 = arith.constant 0 : i32
      %c0_i32_82 = arith.constant 0 : i32
      %104 = tpu.memref_slice %arg2[%103, %c0_i32_82] : memref<1000x128xf32, #tpu.memory_space<any>> -> memref<1x128xf32, #tpu.memory_space<any>>
      %c0_i32_83 = arith.constant 0 : i32
      %c0_i32_84 = arith.constant 0 : i32
      %105 = tpu.memref_slice %arg4[%c0_i32_79, %c0_i32_83, %c0_i32_84] : memref<2x16x128xf32, #tpu.memory_space<vmem>> -> memref<1x1x128xf32, #tpu.memory_space<vmem>>
      %106 = tpu.memref_squeeze %105 : memref<1x1x128xf32, #tpu.memory_space<vmem>> -> memref<1x128xf32, #tpu.memory_space<vmem>>
      %107 = tpu.memref_slice %arg5[%c0_i32_80, %c0_i32_81] : memref<2x16x!tpu.dma_semaphore, #tpu.memory_space<semaphore_mem>> -> memref<1x1x!tpu.dma_semaphore, #tpu.memory_space<semaphore_mem>>
      %108 = tpu.memref_squeeze %107 : memref<1x1x!tpu.dma_semaphore, #tpu.memory_space<semaphore_mem>> -> memref<!tpu.dma_semaphore, #tpu.memory_space<semaphore_mem>>
      tpu.enqueue_dma source(%104 : memref<1x128xf32, #tpu.memory_space<any>>) target(%106 : memref<1x128xf32, #tpu.memory_space<vmem>>) target_semaphore(%108 : memref<!tpu.dma_semaphore, #tpu.memory_space<semaphore_mem>>)
      %c1 = arith.constant 1 : index
      %109 = memref.load %arg1[%c1] : memref<16xi32, #tpu.memory_space<smem>>
      %c0_i32_85 = arith.constant 0 : i32
      %c0_i32_86 = arith.constant 0 : i32
      %c1_i32_87 = arith.constant 1 : i32
      %c0_i32_88 = arith.constant 0 : i32
      %110 = tpu.memref_slice %arg2[%109, %c0_i32_88] : memref<1000x128xf32, #tpu.memory_space<any>> -> memref<1x128xf32, #tpu.memory_space<any>>
      %c1_i32_89 = arith.constant 1 : i32
      %c0_i32_90 = arith.constant 0 : i32
      %111 = tpu.memref_slice %arg4[%c0_i32_85, %c1_i32_89, %c0_i32_90] : memref<2x16x128xf32, #tpu.memory_space<vmem>> -> memref<1x1x128xf32, #tpu.memory_space<vmem>>
      %112 = tpu.memref_squeeze %111 : memref<1x1x128xf32, #tpu.memory_space<vmem>> -> memref<1x128xf32, #tpu.memory_space<vmem>>
      %113 = tpu.memref_slice %arg5[%c0_i32_86, %c1_i32_87] : memref<2x16x!tpu.dma_semaphore, #tpu.memory_space<semaphore_mem>> -> memref<1x1x!tpu.dma_semaphore, #tpu.memory_space<semaphore_mem>>
      %114 = tpu.memref_squeeze %113 : memref<1x1x!tpu.dma_semaphore, #tpu.memory_space<semaphore_mem>> -> memref<!tpu.dma_semaphore, #tpu.memory_space<semaphore_mem>>
      tpu.enqueue_dma source(%110 : memref<1x128xf32, #tpu.memory_space<any>>) target(%112 : memref<1x128xf32, #tpu.memory_space<vmem>>) target_semaphore(%114 : memref<!tpu.dma_semaphore, #tpu.memory_space<semaphore_mem>>)
      %c2 = arith.constant 2 : index
      %115 = memref.load %arg1[%c2] : memref<16xi32, #tpu.memory_space<smem>>
      %c0_i32_91 = arith.constant 0 : i32
      %c0_i32_92 = arith.constant 0 : i32
      %c2_i32_93 = arith.constant 2 : i32
      %c0_i32_94 = arith.constant 0 : i32
      %116 = tpu.memref_slice %arg2[%115, %c0_i32_94] : memref<1000x128xf32, #tpu.memory_space<any>> -> memref<1x128xf32, #tpu.memory_space<any>>
      %c2_i32_95 = arith.constant 2 : i32
      %c0_i32_96 = arith.constant 0 : i32
      %117 = tpu.memref_slice %arg4[%c0_i32_91, %c2_i32_95, %c0_i32_96] : memref<2x16x128xf32, #tpu.memory_space<vmem>> -> memref<1x1x128xf32, #tpu.memory_space<vmem>>
      %118 = tpu.memref_squeeze %117 : memref<1x1x128xf32, #tpu.memory_space<vmem>> -> memref<1x128xf32, #tpu.memory_space<vmem>>
      %119 = tpu.memref_slice %arg5[%c0_i32_92, %c2_i32_93] : memref<2x16x!tpu.dma_semaphore, #tpu.memory_space<semaphore_mem>> -> memref<1x1x!tpu.dma_semaphore, #tpu.memory_space<semaphore_mem>>
      %120 = tpu.memref_squeeze %119 : memref<1x1x!tpu.dma_semaphore, #tpu.memory_space<semaphore_mem>> -> memref<!tpu.dma_semaphore, #tpu.memory_space<semaphore_mem>>
      tpu.enqueue_dma source(%116 : memref<1x128xf32, #tpu.memory_space<any>>) target(%118 : memref<1x128xf32, #tpu.memory_space<vmem>>) target_semaphore(%120 : memref<!tpu.dma_semaphore, #tpu.memory_space<semaphore_mem>>)
      %c3 = arith.constant 3 : index
      %121 = memref.load %arg1[%c3] : memref<16xi32, #tpu.memory_space<smem>>
      %c0_i32_97 = arith.constant 0 : i32
      %c0_i32_98 = arith.constant 0 : i32
      %c3_i32_99 = arith.constant 3 : i32
      %c0_i32_100 = arith.constant 0 : i32
      %122 = tpu.memref_slice %arg2[%121, %c0_i32_100] : memref<1000x128xf32, #tpu.memory_space<any>> -> memref<1x128xf32, #tpu.memory_space<any>>
      %c3_i32_101 = arith.constant 3 : i32
      %c0_i32_102 = arith.constant 0 : i32
      %123 = tpu.memref_slice %arg4[%c0_i32_97, %c3_i32_101, %c0_i32_102] : memref<2x16x128xf32, #tpu.memory_space<vmem>> -> memref<1x1x128xf32, #tpu.memory_space<vmem>>
      %124 = tpu.memref_squeeze %123 : memref<1x1x128xf32, #tpu.memory_space<vmem>> -> memref<1x128xf32, #tpu.memory_space<vmem>>
      %125 = tpu.memref_slice %arg5[%c0_i32_98, %c3_i32_99] : memref<2x16x!tpu.dma_semaphore, #tpu.memory_space<semaphore_mem>> -> memref<1x1x!tpu.dma_semaphore, #tpu.memory_space<semaphore_mem>>
      %126 = tpu.memref_squeeze %125 : memref<1x1x!tpu.dma_semaphore, #tpu.memory_space<semaphore_mem>> -> memref<!tpu.dma_semaphore, #tpu.memory_space<semaphore_mem>>
      tpu.enqueue_dma source(%122 : memref<1x128xf32, #tpu.memory_space<any>>) target(%124 : memref<1x128xf32, #tpu.memory_space<vmem>>) target_semaphore(%126 : memref<!tpu.dma_semaphore, #tpu.memory_space<semaphore_mem>>)
      %c4 = arith.constant 4 : index
      %127 = memref.load %arg1[%c4] : memref<16xi32, #tpu.memory_space<smem>>
      %c0_i32_103 = arith.constant 0 : i32
      %c0_i32_104 = arith.constant 0 : i32
      %c4_i32_105 = arith.constant 4 : i32
      %c0_i32_106 = arith.constant 0 : i32
      %128 = tpu.memref_slice %arg2[%127, %c0_i32_106] : memref<1000x128xf32, #tpu.memory_space<any>> -> memref<1x128xf32, #tpu.memory_space<any>>
      %c4_i32_107 = arith.constant 4 : i32
      %c0_i32_108 = arith.constant 0 : i32
      %129 = tpu.memref_slice %arg4[%c0_i32_103, %c4_i32_107, %c0_i32_108] : memref<2x16x128xf32, #tpu.memory_space<vmem>> -> memref<1x1x128xf32, #tpu.memory_space<vmem>>
      %130 = tpu.memref_squeeze %129 : memref<1x1x128xf32, #tpu.memory_space<vmem>> -> memref<1x128xf32, #tpu.memory_space<vmem>>
      %131 = tpu.memref_slice %arg5[%c0_i32_104, %c4_i32_105] : memref<2x16x!tpu.dma_semaphore, #tpu.memory_space<semaphore_mem>> -> memref<1x1x!tpu.dma_semaphore, #tpu.memory_space<semaphore_mem>>
      %132 = tpu.memref_squeeze %131 : memref<1x1x!tpu.dma_semaphore, #tpu.memory_space<semaphore_mem>> -> memref<!tpu.dma_semaphore, #tpu.memory_space<semaphore_mem>>
      tpu.enqueue_dma source(%128 : memref<1x128xf32, #tpu.memory_space<any>>) target(%130 : memref<1x128xf32, #tpu.memory_space<vmem>>) target_semaphore(%132 : memref<!tpu.dma_semaphore, #tpu.memory_space<semaphore_mem>>)
      %c5 = arith.constant 5 : index
      %133 = memref.load %arg1[%c5] : memref<16xi32, #tpu.memory_space<smem>>
      %c0_i32_109 = arith.constant 0 : i32
      %c0_i32_110 = arith.constant 0 : i32
      %c5_i32_111 = arith.constant 5 : i32
      %c0_i32_112 = arith.constant 0 : i32
      %134 = tpu.memref_slice %arg2[%133, %c0_i32_112] : memref<1000x128xf32, #tpu.memory_space<any>> -> memref<1x128xf32, #tpu.memory_space<any>>
      %c5_i32_113 = arith.constant 5 : i32
      %c0_i32_114 = arith.constant 0 : i32
      %135 = tpu.memref_slice %arg4[%c0_i32_109, %c5_i32_113, %c0_i32_114] : memref<2x16x128xf32, #tpu.memory_space<vmem>> -> memref<1x1x128xf32, #tpu.memory_space<vmem>>
      %136 = tpu.memref_squeeze %135 : memref<1x1x128xf32, #tpu.memory_space<vmem>> -> memref<1x128xf32, #tpu.memory_space<vmem>>
      %137 = tpu.memref_slice %arg5[%c0_i32_110, %c5_i32_111] : memref<2x16x!tpu.dma_semaphore, #tpu.memory_space<semaphore_mem>> -> memref<1x1x!tpu.dma_semaphore, #tpu.memory_space<semaphore_mem>>
      %138 = tpu.memref_squeeze %137 : memref<1x1x!tpu.dma_semaphore, #tpu.memory_space<semaphore_mem>> -> memref<!tpu.dma_semaphore, #tpu.memory_space<semaphore_mem>>
      tpu.enqueue_dma source(%134 : memref<1x128xf32, #tpu.memory_space<any>>) target(%136 : memref<1x128xf32, #tpu.memory_space<vmem>>) target_semaphore(%138 : memref<!tpu.dma_semaphore, #tpu.memory_space<semaphore_mem>>)
      %c6 = arith.constant 6 : index
      %139 = memref.load %arg1[%c6] : memref<16xi32, #tpu.memory_space<smem>>
      %c0_i32_115 = arith.constant 0 : i32
      %c0_i32_116 = arith.constant 0 : i32
      %c6_i32_117 = arith.constant 6 : i32
      %c0_i32_118 = arith.constant 0 : i32
      %140 = tpu.memref_slice %arg2[%139, %c0_i32_118] : memref<1000x128xf32, #tpu.memory_space<any>> -> memref<1x128xf32, #tpu.memory_space<any>>
      %c6_i32_119 = arith.constant 6 : i32
      %c0_i32_120 = arith.constant 0 : i32
      %141 = tpu.memref_slice %arg4[%c0_i32_115, %c6_i32_119, %c0_i32_120] : memref<2x16x128xf32, #tpu.memory_space<vmem>> -> memref<1x1x128xf32, #tpu.memory_space<vmem>>
      %142 = tpu.memref_squeeze %141 : memref<1x1x128xf32, #tpu.memory_space<vmem>> -> memref<1x128xf32, #tpu.memory_space<vmem>>
      %143 = tpu.memref_slice %arg5[%c0_i32_116, %c6_i32_117] : memref<2x16x!tpu.dma_semaphore, #tpu.memory_space<semaphore_mem>> -> memref<1x1x!tpu.dma_semaphore, #tpu.memory_space<semaphore_mem>>
      %144 = tpu.memref_squeeze %143 : memref<1x1x!tpu.dma_semaphore, #tpu.memory_space<semaphore_mem>> -> memref<!tpu.dma_semaphore, #tpu.memory_space<semaphore_mem>>
      tpu.enqueue_dma source(%140 : memref<1x128xf32, #tpu.memory_space<any>>) target(%142 : memref<1x128xf32, #tpu.memory_space<vmem>>) target_semaphore(%144 : memref<!tpu.dma_semaphore, #tpu.memory_space<semaphore_mem>>)
      %c7 = arith.constant 7 : index
      %145 = memref.load %arg1[%c7] : memref<16xi32, #tpu.memory_space<smem>>
      %c0_i32_121 = arith.constant 0 : i32
      %c0_i32_122 = arith.constant 0 : i32
      %c7_i32_123 = arith.constant 7 : i32
      %c0_i32_124 = arith.constant 0 : i32
      %146 = tpu.memref_slice %arg2[%145, %c0_i32_124] : memref<1000x128xf32, #tpu.memory_space<any>> -> memref<1x128xf32, #tpu.memory_space<any>>
      %c7_i32_125 = arith.constant 7 : i32
      %c0_i32_126 = arith.constant 0 : i32
      %147 = tpu.memref_slice %arg4[%c0_i32_121, %c7_i32_125, %c0_i32_126] : memref<2x16x128xf32, #tpu.memory_space<vmem>> -> memref<1x1x128xf32, #tpu.memory_space<vmem>>
      %148 = tpu.memref_squeeze %147 : memref<1x1x128xf32, #tpu.memory_space<vmem>> -> memref<1x128xf32, #tpu.memory_space<vmem>>
      %149 = tpu.memref_slice %arg5[%c0_i32_122, %c7_i32_123] : memref<2x16x!tpu.dma_semaphore, #tpu.memory_space<semaphore_mem>> -> memref<1x1x!tpu.dma_semaphore, #tpu.memory_space<semaphore_mem>>
      %150 = tpu.memref_squeeze %149 : memref<1x1x!tpu.dma_semaphore, #tpu.memory_space<semaphore_mem>> -> memref<!tpu.dma_semaphore, #tpu.memory_space<semaphore_mem>>
      tpu.enqueue_dma source(%146 : memref<1x128xf32, #tpu.memory_space<any>>) target(%148 : memref<1x128xf32, #tpu.memory_space<vmem>>) target_semaphore(%150 : memref<!tpu.dma_semaphore, #tpu.memory_space<semaphore_mem>>)
      %c8 = arith.constant 8 : index
      %151 = memref.load %arg1[%c8] : memref<16xi32, #tpu.memory_space<smem>>
      %c0_i32_127 = arith.constant 0 : i32
      %c0_i32_128 = arith.constant 0 : i32
      %c8_i32_129 = arith.constant 8 : i32
      %c0_i32_130 = arith.constant 0 : i32
      %152 = tpu.memref_slice %arg2[%151, %c0_i32_130] : memref<1000x128xf32, #tpu.memory_space<any>> -> memref<1x128xf32, #tpu.memory_space<any>>
      %c8_i32_131 = arith.constant 8 : i32
      %c0_i32_132 = arith.constant 0 : i32
      %153 = tpu.memref_slice %arg4[%c0_i32_127, %c8_i32_131, %c0_i32_132] : memref<2x16x128xf32, #tpu.memory_space<vmem>> -> memref<1x1x128xf32, #tpu.memory_space<vmem>>
      %154 = tpu.memref_squeeze %153 : memref<1x1x128xf32, #tpu.memory_space<vmem>> -> memref<1x128xf32, #tpu.memory_space<vmem>>
      %155 = tpu.memref_slice %arg5[%c0_i32_128, %c8_i32_129] : memref<2x16x!tpu.dma_semaphore, #tpu.memory_space<semaphore_mem>> -> memref<1x1x!tpu.dma_semaphore, #tpu.memory_space<semaphore_mem>>
      %156 = tpu.memref_squeeze %155 : memref<1x1x!tpu.dma_semaphore, #tpu.memory_space<semaphore_mem>> -> memref<!tpu.dma_semaphore, #tpu.memory_space<semaphore_mem>>
      tpu.enqueue_dma source(%152 : memref<1x128xf32, #tpu.memory_space<any>>) target(%154 : memref<1x128xf32, #tpu.memory_space<vmem>>) target_semaphore(%156 : memref<!tpu.dma_semaphore, #tpu.memory_space<semaphore_mem>>)
      %c9 = arith.constant 9 : index
      %157 = memref.load %arg1[%c9] : memref<16xi32, #tpu.memory_space<smem>>
      %c0_i32_133 = arith.constant 0 : i32
      %c0_i32_134 = arith.constant 0 : i32
      %c9_i32_135 = arith.constant 9 : i32
      %c0_i32_136 = arith.constant 0 : i32
      %158 = tpu.memref_slice %arg2[%157, %c0_i32_136] : memref<1000x128xf32, #tpu.memory_space<any>> -> memref<1x128xf32, #tpu.memory_space<any>>
      %c9_i32_137 = arith.constant 9 : i32
      %c0_i32_138 = arith.constant 0 : i32
      %159 = tpu.memref_slice %arg4[%c0_i32_133, %c9_i32_137, %c0_i32_138] : memref<2x16x128xf32, #tpu.memory_space<vmem>> -> memref<1x1x128xf32, #tpu.memory_space<vmem>>
      %160 = tpu.memref_squeeze %159 : memref<1x1x128xf32, #tpu.memory_space<vmem>> -> memref<1x128xf32, #tpu.memory_space<vmem>>
      %161 = tpu.memref_slice %arg5[%c0_i32_134, %c9_i32_135] : memref<2x16x!tpu.dma_semaphore, #tpu.memory_space<semaphore_mem>> -> memref<1x1x!tpu.dma_semaphore, #tpu.memory_space<semaphore_mem>>
      %162 = tpu.memref_squeeze %161 : memref<1x1x!tpu.dma_semaphore, #tpu.memory_space<semaphore_mem>> -> memref<!tpu.dma_semaphore, #tpu.memory_space<semaphore_mem>>
      tpu.enqueue_dma source(%158 : memref<1x128xf32, #tpu.memory_space<any>>) target(%160 : memref<1x128xf32, #tpu.memory_space<vmem>>) target_semaphore(%162 : memref<!tpu.dma_semaphore, #tpu.memory_space<semaphore_mem>>)
      %c10 = arith.constant 10 : index
      %163 = memref.load %arg1[%c10] : memref<16xi32, #tpu.memory_space<smem>>
      %c0_i32_139 = arith.constant 0 : i32
      %c0_i32_140 = arith.constant 0 : i32
      %c10_i32_141 = arith.constant 10 : i32
      %c0_i32_142 = arith.constant 0 : i32
      %164 = tpu.memref_slice %arg2[%163, %c0_i32_142] : memref<1000x128xf32, #tpu.memory_space<any>> -> memref<1x128xf32, #tpu.memory_space<any>>
      %c10_i32_143 = arith.constant 10 : i32
      %c0_i32_144 = arith.constant 0 : i32
      %165 = tpu.memref_slice %arg4[%c0_i32_139, %c10_i32_143, %c0_i32_144] : memref<2x16x128xf32, #tpu.memory_space<vmem>> -> memref<1x1x128xf32, #tpu.memory_space<vmem>>
      %166 = tpu.memref_squeeze %165 : memref<1x1x128xf32, #tpu.memory_space<vmem>> -> memref<1x128xf32, #tpu.memory_space<vmem>>
      %167 = tpu.memref_slice %arg5[%c0_i32_140, %c10_i32_141] : memref<2x16x!tpu.dma_semaphore, #tpu.memory_space<semaphore_mem>> -> memref<1x1x!tpu.dma_semaphore, #tpu.memory_space<semaphore_mem>>
      %168 = tpu.memref_squeeze %167 : memref<1x1x!tpu.dma_semaphore, #tpu.memory_space<semaphore_mem>> -> memref<!tpu.dma_semaphore, #tpu.memory_space<semaphore_mem>>
      tpu.enqueue_dma source(%164 : memref<1x128xf32, #tpu.memory_space<any>>) target(%166 : memref<1x128xf32, #tpu.memory_space<vmem>>) target_semaphore(%168 : memref<!tpu.dma_semaphore, #tpu.memory_space<semaphore_mem>>)
      %c11 = arith.constant 11 : index
      %169 = memref.load %arg1[%c11] : memref<16xi32, #tpu.memory_space<smem>>
      %c0_i32_145 = arith.constant 0 : i32
      %c0_i32_146 = arith.constant 0 : i32
      %c11_i32_147 = arith.constant 11 : i32
      %c0_i32_148 = arith.constant 0 : i32
      %170 = tpu.memref_slice %arg2[%169, %c0_i32_148] : memref<1000x128xf32, #tpu.memory_space<any>> -> memref<1x128xf32, #tpu.memory_space<any>>
      %c11_i32_149 = arith.constant 11 : i32
      %c0_i32_150 = arith.constant 0 : i32
      %171 = tpu.memref_slice %arg4[%c0_i32_145, %c11_i32_149, %c0_i32_150] : memref<2x16x128xf32, #tpu.memory_space<vmem>> -> memref<1x1x128xf32, #tpu.memory_space<vmem>>
      %172 = tpu.memref_squeeze %171 : memref<1x1x128xf32, #tpu.memory_space<vmem>> -> memref<1x128xf32, #tpu.memory_space<vmem>>
      %173 = tpu.memref_slice %arg5[%c0_i32_146, %c11_i32_147] : memref<2x16x!tpu.dma_semaphore, #tpu.memory_space<semaphore_mem>> -> memref<1x1x!tpu.dma_semaphore, #tpu.memory_space<semaphore_mem>>
      %174 = tpu.memref_squeeze %173 : memref<1x1x!tpu.dma_semaphore, #tpu.memory_space<semaphore_mem>> -> memref<!tpu.dma_semaphore, #tpu.memory_space<semaphore_mem>>
      tpu.enqueue_dma source(%170 : memref<1x128xf32, #tpu.memory_space<any>>) target(%172 : memref<1x128xf32, #tpu.memory_space<vmem>>) target_semaphore(%174 : memref<!tpu.dma_semaphore, #tpu.memory_space<semaphore_mem>>)
      %c12 = arith.constant 12 : index
      %175 = memref.load %arg1[%c12] : memref<16xi32, #tpu.memory_space<smem>>
      %c0_i32_151 = arith.constant 0 : i32
      %c0_i32_152 = arith.constant 0 : i32
      %c12_i32_153 = arith.constant 12 : i32
      %c0_i32_154 = arith.constant 0 : i32
      %176 = tpu.memref_slice %arg2[%175, %c0_i32_154] : memref<1000x128xf32, #tpu.memory_space<any>> -> memref<1x128xf32, #tpu.memory_space<any>>
      %c12_i32_155 = arith.constant 12 : i32
      %c0_i32_156 = arith.constant 0 : i32
      %177 = tpu.memref_slice %arg4[%c0_i32_151, %c12_i32_155, %c0_i32_156] : memref<2x16x128xf32, #tpu.memory_space<vmem>> -> memref<1x1x128xf32, #tpu.memory_space<vmem>>
      %178 = tpu.memref_squeeze %177 : memref<1x1x128xf32, #tpu.memory_space<vmem>> -> memref<1x128xf32, #tpu.memory_space<vmem>>
      %179 = tpu.memref_slice %arg5[%c0_i32_152, %c12_i32_153] : memref<2x16x!tpu.dma_semaphore, #tpu.memory_space<semaphore_mem>> -> memref<1x1x!tpu.dma_semaphore, #tpu.memory_space<semaphore_mem>>
      %180 = tpu.memref_squeeze %179 : memref<1x1x!tpu.dma_semaphore, #tpu.memory_space<semaphore_mem>> -> memref<!tpu.dma_semaphore, #tpu.memory_space<semaphore_mem>>
      tpu.enqueue_dma source(%176 : memref<1x128xf32, #tpu.memory_space<any>>) target(%178 : memref<1x128xf32, #tpu.memory_space<vmem>>) target_semaphore(%180 : memref<!tpu.dma_semaphore, #tpu.memory_space<semaphore_mem>>)
      %c13 = arith.constant 13 : index
      %181 = memref.load %arg1[%c13] : memref<16xi32, #tpu.memory_space<smem>>
      %c0_i32_157 = arith.constant 0 : i32
      %c0_i32_158 = arith.constant 0 : i32
      %c13_i32_159 = arith.constant 13 : i32
      %c0_i32_160 = arith.constant 0 : i32
      %182 = tpu.memref_slice %arg2[%181, %c0_i32_160] : memref<1000x128xf32, #tpu.memory_space<any>> -> memref<1x128xf32, #tpu.memory_space<any>>
      %c13_i32_161 = arith.constant 13 : i32
      %c0_i32_162 = arith.constant 0 : i32
      %183 = tpu.memref_slice %arg4[%c0_i32_157, %c13_i32_161, %c0_i32_162] : memref<2x16x128xf32, #tpu.memory_space<vmem>> -> memref<1x1x128xf32, #tpu.memory_space<vmem>>
      %184 = tpu.memref_squeeze %183 : memref<1x1x128xf32, #tpu.memory_space<vmem>> -> memref<1x128xf32, #tpu.memory_space<vmem>>
      %185 = tpu.memref_slice %arg5[%c0_i32_158, %c13_i32_159] : memref<2x16x!tpu.dma_semaphore, #tpu.memory_space<semaphore_mem>> -> memref<1x1x!tpu.dma_semaphore, #tpu.memory_space<semaphore_mem>>
      %186 = tpu.memref_squeeze %185 : memref<1x1x!tpu.dma_semaphore, #tpu.memory_space<semaphore_mem>> -> memref<!tpu.dma_semaphore, #tpu.memory_space<semaphore_mem>>
      tpu.enqueue_dma source(%182 : memref<1x128xf32, #tpu.memory_space<any>>) target(%184 : memref<1x128xf32, #tpu.memory_space<vmem>>) target_semaphore(%186 : memref<!tpu.dma_semaphore, #tpu.memory_space<semaphore_mem>>)
      %c14 = arith.constant 14 : index
      %187 = memref.load %arg1[%c14] : memref<16xi32, #tpu.memory_space<smem>>
      %c0_i32_163 = arith.constant 0 : i32
      %c0_i32_164 = arith.constant 0 : i32
      %c14_i32_165 = arith.constant 14 : i32
      %c0_i32_166 = arith.constant 0 : i32
      %188 = tpu.memref_slice %arg2[%187, %c0_i32_166] : memref<1000x128xf32, #tpu.memory_space<any>> -> memref<1x128xf32, #tpu.memory_space<any>>
      %c14_i32_167 = arith.constant 14 : i32
      %c0_i32_168 = arith.constant 0 : i32
      %189 = tpu.memref_slice %arg4[%c0_i32_163, %c14_i32_167, %c0_i32_168] : memref<2x16x128xf32, #tpu.memory_space<vmem>> -> memref<1x1x128xf32, #tpu.memory_space<vmem>>
      %190 = tpu.memref_squeeze %189 : memref<1x1x128xf32, #tpu.memory_space<vmem>> -> memref<1x128xf32, #tpu.memory_space<vmem>>
      %191 = tpu.memref_slice %arg5[%c0_i32_164, %c14_i32_165] : memref<2x16x!tpu.dma_semaphore, #tpu.memory_space<semaphore_mem>> -> memref<1x1x!tpu.dma_semaphore, #tpu.memory_space<semaphore_mem>>
      %192 = tpu.memref_squeeze %191 : memref<1x1x!tpu.dma_semaphore, #tpu.memory_space<semaphore_mem>> -> memref<!tpu.dma_semaphore, #tpu.memory_space<semaphore_mem>>
      tpu.enqueue_dma source(%188 : memref<1x128xf32, #tpu.memory_space<any>>) target(%190 : memref<1x128xf32, #tpu.memory_space<vmem>>) target_semaphore(%192 : memref<!tpu.dma_semaphore, #tpu.memory_space<semaphore_mem>>)
      %c15 = arith.constant 15 : index
      %193 = memref.load %arg1[%c15] : memref<16xi32, #tpu.memory_space<smem>>
      %c0_i32_169 = arith.constant 0 : i32
      %c0_i32_170 = arith.constant 0 : i32
      %c15_i32_171 = arith.constant 15 : i32
      %c0_i32_172 = arith.constant 0 : i32
      %194 = tpu.memref_slice %arg2[%193, %c0_i32_172] : memref<1000x128xf32, #tpu.memory_space<any>> -> memref<1x128xf32, #tpu.memory_space<any>>
      %c15_i32_173 = arith.constant 15 : i32
      %c0_i32_174 = arith.constant 0 : i32
      %195 = tpu.memref_slice %arg4[%c0_i32_169, %c15_i32_173, %c0_i32_174] : memref<2x16x128xf32, #tpu.memory_space<vmem>> -> memref<1x1x128xf32, #tpu.memory_space<vmem>>
      %196 = tpu.memref_squeeze %195 : memref<1x1x128xf32, #tpu.memory_space<vmem>> -> memref<1x128xf32, #tpu.memory_space<vmem>>
      %197 = tpu.memref_slice %arg5[%c0_i32_170, %c15_i32_171] : memref<2x16x!tpu.dma_semaphore, #tpu.memory_space<semaphore_mem>> -> memref<1x1x!tpu.dma_semaphore, #tpu.memory_space<semaphore_mem>>
      %198 = tpu.memref_squeeze %197 : memref<1x1x!tpu.dma_semaphore, #tpu.memory_space<semaphore_mem>> -> memref<!tpu.dma_semaphore, #tpu.memory_space<semaphore_mem>>
      tpu.enqueue_dma source(%194 : memref<1x128xf32, #tpu.memory_space<any>>) target(%196 : memref<1x128xf32, #tpu.memory_space<vmem>>) target_semaphore(%198 : memref<!tpu.dma_semaphore, #tpu.memory_space<semaphore_mem>>)
    } else {
    }
    %c1_i32 = arith.constant 1 : i32
    %3 = arith.addi %arg0, %c1_i32 : i32
    %c1_i32_1 = arith.constant 1 : i32
    %4 = arith.cmpi slt, %3, %c1_i32_1 : i32
    %5 = arith.extui %4 : i1 to i32
    %c0_i32_2 = arith.constant 0 : i32
    %6 = arith.cmpi ne, %5, %c0_i32_2 : i32
    scf.if %6 {
      %c1_i32_78 = arith.constant 1 : i32
      %103 = arith.addi %arg0, %c1_i32_78 : i32
      %c1_i32_79 = arith.constant 1 : i32
      %104 = arith.addi %arg0, %c1_i32_79 : i32
      %c2_i32_80 = arith.constant 2 : i32
      %c0_i32_81 = arith.constant 0 : i32
      %105 = arith.cmpi eq, %c2_i32_80, %c0_i32_81 : i32
      %c1_i32_82 = arith.constant 1 : i32
      %106 = arith.select %105, %c1_i32_82, %c2_i32_80 : i32
      %107 = arith.remsi %104, %106 : i32
      %c0_i32_83 = arith.constant 0 : i32
      %108 = arith.cmpi ne, %107, %c0_i32_83 : i32
      %c0_i32_84 = arith.constant 0 : i32
      %109 = arith.cmpi slt, %107, %c0_i32_84 : i32
      %c0_i32_85 = arith.constant 0 : i32
      %110 = arith.cmpi slt, %106, %c0_i32_85 : i32
      %111 = arith.xori %109, %110 : i1
      %112 = arith.andi %111, %108 : i1
      %113 = arith.addi %107, %106 : i32
      %114 = arith.select %112, %113, %107 : i32
      %c16_i32 = arith.constant 16 : i32
      %115 = arith.muli %103, %c16_i32 : i32
      %c0_i32_86 = arith.constant 0 : i32
      %116 = arith.addi %115, %c0_i32_86 : i32
      %117 = arith.index_cast %116 : i32 to index
      %118 = memref.load %arg1[%117] : memref<16xi32, #tpu.memory_space<smem>>
      %c0_i32_87 = arith.constant 0 : i32
      %c0_i32_88 = arith.constant 0 : i32
      %119 = tpu.memref_slice %arg2[%118, %c0_i32_88] : memref<1000x128xf32, #tpu.memory_space<any>> -> memref<1x128xf32, #tpu.memory_space<any>>
      %c0_i32_89 = arith.constant 0 : i32
      %c0_i32_90 = arith.constant 0 : i32
      %120 = tpu.memref_slice %arg4[%114, %c0_i32_89, %c0_i32_90] : memref<2x16x128xf32, #tpu.memory_space<vmem>> -> memref<1x1x128xf32, #tpu.memory_space<vmem>>
      %121 = tpu.memref_squeeze %120 : memref<1x1x128xf32, #tpu.memory_space<vmem>> -> memref<1x128xf32, #tpu.memory_space<vmem>>
      %122 = tpu.memref_slice %arg5[%114, %c0_i32_87] : memref<2x16x!tpu.dma_semaphore, #tpu.memory_space<semaphore_mem>> -> memref<1x1x!tpu.dma_semaphore, #tpu.memory_space<semaphore_mem>>
      %123 = tpu.memref_squeeze %122 : memref<1x1x!tpu.dma_semaphore, #tpu.memory_space<semaphore_mem>> -> memref<!tpu.dma_semaphore, #tpu.memory_space<semaphore_mem>>
      tpu.enqueue_dma source(%119 : memref<1x128xf32, #tpu.memory_space<any>>) target(%121 : memref<1x128xf32, #tpu.memory_space<vmem>>) target_semaphore(%123 : memref<!tpu.dma_semaphore, #tpu.memory_space<semaphore_mem>>)
      %c1_i32_91 = arith.constant 1 : i32
      %124 = arith.addi %115, %c1_i32_91 : i32
      %125 = arith.index_cast %124 : i32 to index
      %126 = memref.load %arg1[%125] : memref<16xi32, #tpu.memory_space<smem>>
      %c1_i32_92 = arith.constant 1 : i32
      %c0_i32_93 = arith.constant 0 : i32
      %127 = tpu.memref_slice %arg2[%126, %c0_i32_93] : memref<1000x128xf32, #tpu.memory_space<any>> -> memref<1x128xf32, #tpu.memory_space<any>>
      %c1_i32_94 = arith.constant 1 : i32
      %c0_i32_95 = arith.constant 0 : i32
      %128 = tpu.memref_slice %arg4[%114, %c1_i32_94, %c0_i32_95] : memref<2x16x128xf32, #tpu.memory_space<vmem>> -> memref<1x1x128xf32, #tpu.memory_space<vmem>>
      %129 = tpu.memref_squeeze %128 : memref<1x1x128xf32, #tpu.memory_space<vmem>> -> memref<1x128xf32, #tpu.memory_space<vmem>>
      %130 = tpu.memref_slice %arg5[%114, %c1_i32_92] : memref<2x16x!tpu.dma_semaphore, #tpu.memory_space<semaphore_mem>> -> memref<1x1x!tpu.dma_semaphore, #tpu.memory_space<semaphore_mem>>
      %131 = tpu.memref_squeeze %130 : memref<1x1x!tpu.dma_semaphore, #tpu.memory_space<semaphore_mem>> -> memref<!tpu.dma_semaphore, #tpu.memory_space<semaphore_mem>>
      tpu.enqueue_dma source(%127 : memref<1x128xf32, #tpu.memory_space<any>>) target(%129 : memref<1x128xf32, #tpu.memory_space<vmem>>) target_semaphore(%131 : memref<!tpu.dma_semaphore, #tpu.memory_space<semaphore_mem>>)
      %c2_i32_96 = arith.constant 2 : i32
      %132 = arith.addi %115, %c2_i32_96 : i32
      %133 = arith.index_cast %132 : i32 to index
      %134 = memref.load %arg1[%133] : memref<16xi32, #tpu.memory_space<smem>>
      %c2_i32_97 = arith.constant 2 : i32
      %c0_i32_98 = arith.constant 0 : i32
      %135 = tpu.memref_slice %arg2[%134, %c0_i32_98] : memref<1000x128xf32, #tpu.memory_space<any>> -> memref<1x128xf32, #tpu.memory_space<any>>
      %c2_i32_99 = arith.constant 2 : i32
      %c0_i32_100 = arith.constant 0 : i32
      %136 = tpu.memref_slice %arg4[%114, %c2_i32_99, %c0_i32_100] : memref<2x16x128xf32, #tpu.memory_space<vmem>> -> memref<1x1x128xf32, #tpu.memory_space<vmem>>
      %137 = tpu.memref_squeeze %136 : memref<1x1x128xf32, #tpu.memory_space<vmem>> -> memref<1x128xf32, #tpu.memory_space<vmem>>
      %138 = tpu.memref_slice %arg5[%114, %c2_i32_97] : memref<2x16x!tpu.dma_semaphore, #tpu.memory_space<semaphore_mem>> -> memref<1x1x!tpu.dma_semaphore, #tpu.memory_space<semaphore_mem>>
      %139 = tpu.memref_squeeze %138 : memref<1x1x!tpu.dma_semaphore, #tpu.memory_space<semaphore_mem>> -> memref<!tpu.dma_semaphore, #tpu.memory_space<semaphore_mem>>
      tpu.enqueue_dma source(%135 : memref<1x128xf32, #tpu.memory_space<any>>) target(%137 : memref<1x128xf32, #tpu.memory_space<vmem>>) target_semaphore(%139 : memref<!tpu.dma_semaphore, #tpu.memory_space<semaphore_mem>>)
      %c3_i32_101 = arith.constant 3 : i32
      %140 = arith.addi %115, %c3_i32_101 : i32
      %141 = arith.index_cast %140 : i32 to index
      %142 = memref.load %arg1[%141] : memref<16xi32, #tpu.memory_space<smem>>
      %c3_i32_102 = arith.constant 3 : i32
      %c0_i32_103 = arith.constant 0 : i32
      %143 = tpu.memref_slice %arg2[%142, %c0_i32_103] : memref<1000x128xf32, #tpu.memory_space<any>> -> memref<1x128xf32, #tpu.memory_space<any>>
      %c3_i32_104 = arith.constant 3 : i32
      %c0_i32_105 = arith.constant 0 : i32
      %144 = tpu.memref_slice %arg4[%114, %c3_i32_104, %c0_i32_105] : memref<2x16x128xf32, #tpu.memory_space<vmem>> -> memref<1x1x128xf32, #tpu.memory_space<vmem>>
      %145 = tpu.memref_squeeze %144 : memref<1x1x128xf32, #tpu.memory_space<vmem>> -> memref<1x128xf32, #tpu.memory_space<vmem>>
      %146 = tpu.memref_slice %arg5[%114, %c3_i32_102] : memref<2x16x!tpu.dma_semaphore, #tpu.memory_space<semaphore_mem>> -> memref<1x1x!tpu.dma_semaphore, #tpu.memory_space<semaphore_mem>>
      %147 = tpu.memref_squeeze %146 : memref<1x1x!tpu.dma_semaphore, #tpu.memory_space<semaphore_mem>> -> memref<!tpu.dma_semaphore, #tpu.memory_space<semaphore_mem>>
      tpu.enqueue_dma source(%143 : memref<1x128xf32, #tpu.memory_space<any>>) target(%145 : memref<1x128xf32, #tpu.memory_space<vmem>>) target_semaphore(%147 : memref<!tpu.dma_semaphore, #tpu.memory_space<semaphore_mem>>)
      %c4_i32_106 = arith.constant 4 : i32
      %148 = arith.addi %115, %c4_i32_106 : i32
      %149 = arith.index_cast %148 : i32 to index
      %150 = memref.load %arg1[%149] : memref<16xi32, #tpu.memory_space<smem>>
      %c4_i32_107 = arith.constant 4 : i32
      %c0_i32_108 = arith.constant 0 : i32
      %151 = tpu.memref_slice %arg2[%150, %c0_i32_108] : memref<1000x128xf32, #tpu.memory_space<any>> -> memref<1x128xf32, #tpu.memory_space<any>>
      %c4_i32_109 = arith.constant 4 : i32
      %c0_i32_110 = arith.constant 0 : i32
      %152 = tpu.memref_slice %arg4[%114, %c4_i32_109, %c0_i32_110] : memref<2x16x128xf32, #tpu.memory_space<vmem>> -> memref<1x1x128xf32, #tpu.memory_space<vmem>>
      %153 = tpu.memref_squeeze %152 : memref<1x1x128xf32, #tpu.memory_space<vmem>> -> memref<1x128xf32, #tpu.memory_space<vmem>>
      %154 = tpu.memref_slice %arg5[%114, %c4_i32_107] : memref<2x16x!tpu.dma_semaphore, #tpu.memory_space<semaphore_mem>> -> memref<1x1x!tpu.dma_semaphore, #tpu.memory_space<semaphore_mem>>
      %155 = tpu.memref_squeeze %154 : memref<1x1x!tpu.dma_semaphore, #tpu.memory_space<semaphore_mem>> -> memref<!tpu.dma_semaphore, #tpu.memory_space<semaphore_mem>>
      tpu.enqueue_dma source(%151 : memref<1x128xf32, #tpu.memory_space<any>>) target(%153 : memref<1x128xf32, #tpu.memory_space<vmem>>) target_semaphore(%155 : memref<!tpu.dma_semaphore, #tpu.memory_space<semaphore_mem>>)
      %c5_i32_111 = arith.constant 5 : i32
      %156 = arith.addi %115, %c5_i32_111 : i32
      %157 = arith.index_cast %156 : i32 to index
      %158 = memref.load %arg1[%157] : memref<16xi32, #tpu.memory_space<smem>>
      %c5_i32_112 = arith.constant 5 : i32
      %c0_i32_113 = arith.constant 0 : i32
      %159 = tpu.memref_slice %arg2[%158, %c0_i32_113] : memref<1000x128xf32, #tpu.memory_space<any>> -> memref<1x128xf32, #tpu.memory_space<any>>
      %c5_i32_114 = arith.constant 5 : i32
      %c0_i32_115 = arith.constant 0 : i32
      %160 = tpu.memref_slice %arg4[%114, %c5_i32_114, %c0_i32_115] : memref<2x16x128xf32, #tpu.memory_space<vmem>> -> memref<1x1x128xf32, #tpu.memory_space<vmem>>
      %161 = tpu.memref_squeeze %160 : memref<1x1x128xf32, #tpu.memory_space<vmem>> -> memref<1x128xf32, #tpu.memory_space<vmem>>
      %162 = tpu.memref_slice %arg5[%114, %c5_i32_112] : memref<2x16x!tpu.dma_semaphore, #tpu.memory_space<semaphore_mem>> -> memref<1x1x!tpu.dma_semaphore, #tpu.memory_space<semaphore_mem>>
      %163 = tpu.memref_squeeze %162 : memref<1x1x!tpu.dma_semaphore, #tpu.memory_space<semaphore_mem>> -> memref<!tpu.dma_semaphore, #tpu.memory_space<semaphore_mem>>
      tpu.enqueue_dma source(%159 : memref<1x128xf32, #tpu.memory_space<any>>) target(%161 : memref<1x128xf32, #tpu.memory_space<vmem>>) target_semaphore(%163 : memref<!tpu.dma_semaphore, #tpu.memory_space<semaphore_mem>>)
      %c6_i32_116 = arith.constant 6 : i32
      %164 = arith.addi %115, %c6_i32_116 : i32
      %165 = arith.index_cast %164 : i32 to index
      %166 = memref.load %arg1[%165] : memref<16xi32, #tpu.memory_space<smem>>
      %c6_i32_117 = arith.constant 6 : i32
      %c0_i32_118 = arith.constant 0 : i32
      %167 = tpu.memref_slice %arg2[%166, %c0_i32_118] : memref<1000x128xf32, #tpu.memory_space<any>> -> memref<1x128xf32, #tpu.memory_space<any>>
      %c6_i32_119 = arith.constant 6 : i32
      %c0_i32_120 = arith.constant 0 : i32
      %168 = tpu.memref_slice %arg4[%114, %c6_i32_119, %c0_i32_120] : memref<2x16x128xf32, #tpu.memory_space<vmem>> -> memref<1x1x128xf32, #tpu.memory_space<vmem>>
      %169 = tpu.memref_squeeze %168 : memref<1x1x128xf32, #tpu.memory_space<vmem>> -> memref<1x128xf32, #tpu.memory_space<vmem>>
      %170 = tpu.memref_slice %arg5[%114, %c6_i32_117] : memref<2x16x!tpu.dma_semaphore, #tpu.memory_space<semaphore_mem>> -> memref<1x1x!tpu.dma_semaphore, #tpu.memory_space<semaphore_mem>>
      %171 = tpu.memref_squeeze %170 : memref<1x1x!tpu.dma_semaphore, #tpu.memory_space<semaphore_mem>> -> memref<!tpu.dma_semaphore, #tpu.memory_space<semaphore_mem>>
      tpu.enqueue_dma source(%167 : memref<1x128xf32, #tpu.memory_space<any>>) target(%169 : memref<1x128xf32, #tpu.memory_space<vmem>>) target_semaphore(%171 : memref<!tpu.dma_semaphore, #tpu.memory_space<semaphore_mem>>)
      %c7_i32_121 = arith.constant 7 : i32
      %172 = arith.addi %115, %c7_i32_121 : i32
      %173 = arith.index_cast %172 : i32 to index
      %174 = memref.load %arg1[%173] : memref<16xi32, #tpu.memory_space<smem>>
      %c7_i32_122 = arith.constant 7 : i32
      %c0_i32_123 = arith.constant 0 : i32
      %175 = tpu.memref_slice %arg2[%174, %c0_i32_123] : memref<1000x128xf32, #tpu.memory_space<any>> -> memref<1x128xf32, #tpu.memory_space<any>>
      %c7_i32_124 = arith.constant 7 : i32
      %c0_i32_125 = arith.constant 0 : i32
      %176 = tpu.memref_slice %arg4[%114, %c7_i32_124, %c0_i32_125] : memref<2x16x128xf32, #tpu.memory_space<vmem>> -> memref<1x1x128xf32, #tpu.memory_space<vmem>>
      %177 = tpu.memref_squeeze %176 : memref<1x1x128xf32, #tpu.memory_space<vmem>> -> memref<1x128xf32, #tpu.memory_space<vmem>>
      %178 = tpu.memref_slice %arg5[%114, %c7_i32_122] : memref<2x16x!tpu.dma_semaphore, #tpu.memory_space<semaphore_mem>> -> memref<1x1x!tpu.dma_semaphore, #tpu.memory_space<semaphore_mem>>
      %179 = tpu.memref_squeeze %178 : memref<1x1x!tpu.dma_semaphore, #tpu.memory_space<semaphore_mem>> -> memref<!tpu.dma_semaphore, #tpu.memory_space<semaphore_mem>>
      tpu.enqueue_dma source(%175 : memref<1x128xf32, #tpu.memory_space<any>>) target(%177 : memref<1x128xf32, #tpu.memory_space<vmem>>) target_semaphore(%179 : memref<!tpu.dma_semaphore, #tpu.memory_space<semaphore_mem>>)
      %c8_i32_126 = arith.constant 8 : i32
      %180 = arith.addi %115, %c8_i32_126 : i32
      %181 = arith.index_cast %180 : i32 to index
      %182 = memref.load %arg1[%181] : memref<16xi32, #tpu.memory_space<smem>>
      %c8_i32_127 = arith.constant 8 : i32
      %c0_i32_128 = arith.constant 0 : i32
      %183 = tpu.memref_slice %arg2[%182, %c0_i32_128] : memref<1000x128xf32, #tpu.memory_space<any>> -> memref<1x128xf32, #tpu.memory_space<any>>
      %c8_i32_129 = arith.constant 8 : i32
      %c0_i32_130 = arith.constant 0 : i32
      %184 = tpu.memref_slice %arg4[%114, %c8_i32_129, %c0_i32_130] : memref<2x16x128xf32, #tpu.memory_space<vmem>> -> memref<1x1x128xf32, #tpu.memory_space<vmem>>
      %185 = tpu.memref_squeeze %184 : memref<1x1x128xf32, #tpu.memory_space<vmem>> -> memref<1x128xf32, #tpu.memory_space<vmem>>
      %186 = tpu.memref_slice %arg5[%114, %c8_i32_127] : memref<2x16x!tpu.dma_semaphore, #tpu.memory_space<semaphore_mem>> -> memref<1x1x!tpu.dma_semaphore, #tpu.memory_space<semaphore_mem>>
      %187 = tpu.memref_squeeze %186 : memref<1x1x!tpu.dma_semaphore, #tpu.memory_space<semaphore_mem>> -> memref<!tpu.dma_semaphore, #tpu.memory_space<semaphore_mem>>
      tpu.enqueue_dma source(%183 : memref<1x128xf32, #tpu.memory_space<any>>) target(%185 : memref<1x128xf32, #tpu.memory_space<vmem>>) target_semaphore(%187 : memref<!tpu.dma_semaphore, #tpu.memory_space<semaphore_mem>>)
      %c9_i32_131 = arith.constant 9 : i32
      %188 = arith.addi %115, %c9_i32_131 : i32
      %189 = arith.index_cast %188 : i32 to index
      %190 = memref.load %arg1[%189] : memref<16xi32, #tpu.memory_space<smem>>
      %c9_i32_132 = arith.constant 9 : i32
      %c0_i32_133 = arith.constant 0 : i32
      %191 = tpu.memref_slice %arg2[%190, %c0_i32_133] : memref<1000x128xf32, #tpu.memory_space<any>> -> memref<1x128xf32, #tpu.memory_space<any>>
      %c9_i32_134 = arith.constant 9 : i32
      %c0_i32_135 = arith.constant 0 : i32
      %192 = tpu.memref_slice %arg4[%114, %c9_i32_134, %c0_i32_135] : memref<2x16x128xf32, #tpu.memory_space<vmem>> -> memref<1x1x128xf32, #tpu.memory_space<vmem>>
      %193 = tpu.memref_squeeze %192 : memref<1x1x128xf32, #tpu.memory_space<vmem>> -> memref<1x128xf32, #tpu.memory_space<vmem>>
      %194 = tpu.memref_slice %arg5[%114, %c9_i32_132] : memref<2x16x!tpu.dma_semaphore, #tpu.memory_space<semaphore_mem>> -> memref<1x1x!tpu.dma_semaphore, #tpu.memory_space<semaphore_mem>>
      %195 = tpu.memref_squeeze %194 : memref<1x1x!tpu.dma_semaphore, #tpu.memory_space<semaphore_mem>> -> memref<!tpu.dma_semaphore, #tpu.memory_space<semaphore_mem>>
      tpu.enqueue_dma source(%191 : memref<1x128xf32, #tpu.memory_space<any>>) target(%193 : memref<1x128xf32, #tpu.memory_space<vmem>>) target_semaphore(%195 : memref<!tpu.dma_semaphore, #tpu.memory_space<semaphore_mem>>)
      %c10_i32_136 = arith.constant 10 : i32
      %196 = arith.addi %115, %c10_i32_136 : i32
      %197 = arith.index_cast %196 : i32 to index
      %198 = memref.load %arg1[%197] : memref<16xi32, #tpu.memory_space<smem>>
      %c10_i32_137 = arith.constant 10 : i32
      %c0_i32_138 = arith.constant 0 : i32
      %199 = tpu.memref_slice %arg2[%198, %c0_i32_138] : memref<1000x128xf32, #tpu.memory_space<any>> -> memref<1x128xf32, #tpu.memory_space<any>>
      %c10_i32_139 = arith.constant 10 : i32
      %c0_i32_140 = arith.constant 0 : i32
      %200 = tpu.memref_slice %arg4[%114, %c10_i32_139, %c0_i32_140] : memref<2x16x128xf32, #tpu.memory_space<vmem>> -> memref<1x1x128xf32, #tpu.memory_space<vmem>>
      %201 = tpu.memref_squeeze %200 : memref<1x1x128xf32, #tpu.memory_space<vmem>> -> memref<1x128xf32, #tpu.memory_space<vmem>>
      %202 = tpu.memref_slice %arg5[%114, %c10_i32_137] : memref<2x16x!tpu.dma_semaphore, #tpu.memory_space<semaphore_mem>> -> memref<1x1x!tpu.dma_semaphore, #tpu.memory_space<semaphore_mem>>
      %203 = tpu.memref_squeeze %202 : memref<1x1x!tpu.dma_semaphore, #tpu.memory_space<semaphore_mem>> -> memref<!tpu.dma_semaphore, #tpu.memory_space<semaphore_mem>>
      tpu.enqueue_dma source(%199 : memref<1x128xf32, #tpu.memory_space<any>>) target(%201 : memref<1x128xf32, #tpu.memory_space<vmem>>) target_semaphore(%203 : memref<!tpu.dma_semaphore, #tpu.memory_space<semaphore_mem>>)
      %c11_i32_141 = arith.constant 11 : i32
      %204 = arith.addi %115, %c11_i32_141 : i32
      %205 = arith.index_cast %204 : i32 to index
      %206 = memref.load %arg1[%205] : memref<16xi32, #tpu.memory_space<smem>>
      %c11_i32_142 = arith.constant 11 : i32
      %c0_i32_143 = arith.constant 0 : i32
      %207 = tpu.memref_slice %arg2[%206, %c0_i32_143] : memref<1000x128xf32, #tpu.memory_space<any>> -> memref<1x128xf32, #tpu.memory_space<any>>
      %c11_i32_144 = arith.constant 11 : i32
      %c0_i32_145 = arith.constant 0 : i32
      %208 = tpu.memref_slice %arg4[%114, %c11_i32_144, %c0_i32_145] : memref<2x16x128xf32, #tpu.memory_space<vmem>> -> memref<1x1x128xf32, #tpu.memory_space<vmem>>
      %209 = tpu.memref_squeeze %208 : memref<1x1x128xf32, #tpu.memory_space<vmem>> -> memref<1x128xf32, #tpu.memory_space<vmem>>
      %210 = tpu.memref_slice %arg5[%114, %c11_i32_142] : memref<2x16x!tpu.dma_semaphore, #tpu.memory_space<semaphore_mem>> -> memref<1x1x!tpu.dma_semaphore, #tpu.memory_space<semaphore_mem>>
      %211 = tpu.memref_squeeze %210 : memref<1x1x!tpu.dma_semaphore, #tpu.memory_space<semaphore_mem>> -> memref<!tpu.dma_semaphore, #tpu.memory_space<semaphore_mem>>
      tpu.enqueue_dma source(%207 : memref<1x128xf32, #tpu.memory_space<any>>) target(%209 : memref<1x128xf32, #tpu.memory_space<vmem>>) target_semaphore(%211 : memref<!tpu.dma_semaphore, #tpu.memory_space<semaphore_mem>>)
      %c12_i32_146 = arith.constant 12 : i32
      %212 = arith.addi %115, %c12_i32_146 : i32
      %213 = arith.index_cast %212 : i32 to index
      %214 = memref.load %arg1[%213] : memref<16xi32, #tpu.memory_space<smem>>
      %c12_i32_147 = arith.constant 12 : i32
      %c0_i32_148 = arith.constant 0 : i32
      %215 = tpu.memref_slice %arg2[%214, %c0_i32_148] : memref<1000x128xf32, #tpu.memory_space<any>> -> memref<1x128xf32, #tpu.memory_space<any>>
      %c12_i32_149 = arith.constant 12 : i32
      %c0_i32_150 = arith.constant 0 : i32
      %216 = tpu.memref_slice %arg4[%114, %c12_i32_149, %c0_i32_150] : memref<2x16x128xf32, #tpu.memory_space<vmem>> -> memref<1x1x128xf32, #tpu.memory_space<vmem>>
      %217 = tpu.memref_squeeze %216 : memref<1x1x128xf32, #tpu.memory_space<vmem>> -> memref<1x128xf32, #tpu.memory_space<vmem>>
      %218 = tpu.memref_slice %arg5[%114, %c12_i32_147] : memref<2x16x!tpu.dma_semaphore, #tpu.memory_space<semaphore_mem>> -> memref<1x1x!tpu.dma_semaphore, #tpu.memory_space<semaphore_mem>>
      %219 = tpu.memref_squeeze %218 : memref<1x1x!tpu.dma_semaphore, #tpu.memory_space<semaphore_mem>> -> memref<!tpu.dma_semaphore, #tpu.memory_space<semaphore_mem>>
      tpu.enqueue_dma source(%215 : memref<1x128xf32, #tpu.memory_space<any>>) target(%217 : memref<1x128xf32, #tpu.memory_space<vmem>>) target_semaphore(%219 : memref<!tpu.dma_semaphore, #tpu.memory_space<semaphore_mem>>)
      %c13_i32_151 = arith.constant 13 : i32
      %220 = arith.addi %115, %c13_i32_151 : i32
      %221 = arith.index_cast %220 : i32 to index
      %222 = memref.load %arg1[%221] : memref<16xi32, #tpu.memory_space<smem>>
      %c13_i32_152 = arith.constant 13 : i32
      %c0_i32_153 = arith.constant 0 : i32
      %223 = tpu.memref_slice %arg2[%222, %c0_i32_153] : memref<1000x128xf32, #tpu.memory_space<any>> -> memref<1x128xf32, #tpu.memory_space<any>>
      %c13_i32_154 = arith.constant 13 : i32
      %c0_i32_155 = arith.constant 0 : i32
      %224 = tpu.memref_slice %arg4[%114, %c13_i32_154, %c0_i32_155] : memref<2x16x128xf32, #tpu.memory_space<vmem>> -> memref<1x1x128xf32, #tpu.memory_space<vmem>>
      %225 = tpu.memref_squeeze %224 : memref<1x1x128xf32, #tpu.memory_space<vmem>> -> memref<1x128xf32, #tpu.memory_space<vmem>>
      %226 = tpu.memref_slice %arg5[%114, %c13_i32_152] : memref<2x16x!tpu.dma_semaphore, #tpu.memory_space<semaphore_mem>> -> memref<1x1x!tpu.dma_semaphore, #tpu.memory_space<semaphore_mem>>
      %227 = tpu.memref_squeeze %226 : memref<1x1x!tpu.dma_semaphore, #tpu.memory_space<semaphore_mem>> -> memref<!tpu.dma_semaphore, #tpu.memory_space<semaphore_mem>>
      tpu.enqueue_dma source(%223 : memref<1x128xf32, #tpu.memory_space<any>>) target(%225 : memref<1x128xf32, #tpu.memory_space<vmem>>) target_semaphore(%227 : memref<!tpu.dma_semaphore, #tpu.memory_space<semaphore_mem>>)
      %c14_i32_156 = arith.constant 14 : i32
      %228 = arith.addi %115, %c14_i32_156 : i32
      %229 = arith.index_cast %228 : i32 to index
      %230 = memref.load %arg1[%229] : memref<16xi32, #tpu.memory_space<smem>>
      %c14_i32_157 = arith.constant 14 : i32
      %c0_i32_158 = arith.constant 0 : i32
      %231 = tpu.memref_slice %arg2[%230, %c0_i32_158] : memref<1000x128xf32, #tpu.memory_space<any>> -> memref<1x128xf32, #tpu.memory_space<any>>
      %c14_i32_159 = arith.constant 14 : i32
      %c0_i32_160 = arith.constant 0 : i32
      %232 = tpu.memref_slice %arg4[%114, %c14_i32_159, %c0_i32_160] : memref<2x16x128xf32, #tpu.memory_space<vmem>> -> memref<1x1x128xf32, #tpu.memory_space<vmem>>
      %233 = tpu.memref_squeeze %232 : memref<1x1x128xf32, #tpu.memory_space<vmem>> -> memref<1x128xf32, #tpu.memory_space<vmem>>
      %234 = tpu.memref_slice %arg5[%114, %c14_i32_157] : memref<2x16x!tpu.dma_semaphore, #tpu.memory_space<semaphore_mem>> -> memref<1x1x!tpu.dma_semaphore, #tpu.memory_space<semaphore_mem>>
      %235 = tpu.memref_squeeze %234 : memref<1x1x!tpu.dma_semaphore, #tpu.memory_space<semaphore_mem>> -> memref<!tpu.dma_semaphore, #tpu.memory_space<semaphore_mem>>
      tpu.enqueue_dma source(%231 : memref<1x128xf32, #tpu.memory_space<any>>) target(%233 : memref<1x128xf32, #tpu.memory_space<vmem>>) target_semaphore(%235 : memref<!tpu.dma_semaphore, #tpu.memory_space<semaphore_mem>>)
      %c15_i32_161 = arith.constant 15 : i32
      %236 = arith.addi %115, %c15_i32_161 : i32
      %237 = arith.index_cast %236 : i32 to index
      %238 = memref.load %arg1[%237] : memref<16xi32, #tpu.memory_space<smem>>
      %c15_i32_162 = arith.constant 15 : i32
      %c0_i32_163 = arith.constant 0 : i32
      %239 = tpu.memref_slice %arg2[%238, %c0_i32_163] : memref<1000x128xf32, #tpu.memory_space<any>> -> memref<1x128xf32, #tpu.memory_space<any>>
      %c15_i32_164 = arith.constant 15 : i32
      %c0_i32_165 = arith.constant 0 : i32
      %240 = tpu.memref_slice %arg4[%114, %c15_i32_164, %c0_i32_165] : memref<2x16x128xf32, #tpu.memory_space<vmem>> -> memref<1x1x128xf32, #tpu.memory_space<vmem>>
      %241 = tpu.memref_squeeze %240 : memref<1x1x128xf32, #tpu.memory_space<vmem>> -> memref<1x128xf32, #tpu.memory_space<vmem>>
      %242 = tpu.memref_slice %arg5[%114, %c15_i32_162] : memref<2x16x!tpu.dma_semaphore, #tpu.memory_space<semaphore_mem>> -> memref<1x1x!tpu.dma_semaphore, #tpu.memory_space<semaphore_mem>>
      %243 = tpu.memref_squeeze %242 : memref<1x1x!tpu.dma_semaphore, #tpu.memory_space<semaphore_mem>> -> memref<!tpu.dma_semaphore, #tpu.memory_space<semaphore_mem>>
      tpu.enqueue_dma source(%239 : memref<1x128xf32, #tpu.memory_space<any>>) target(%241 : memref<1x128xf32, #tpu.memory_space<vmem>>) target_semaphore(%243 : memref<!tpu.dma_semaphore, #tpu.memory_space<semaphore_mem>>)
    } else {
    }
    %c2_i32 = arith.constant 2 : i32
    %c0_i32_3 = arith.constant 0 : i32
    %7 = arith.cmpi eq, %c2_i32, %c0_i32_3 : i32
    %c1_i32_4 = arith.constant 1 : i32
    %8 = arith.select %7, %c1_i32_4, %c2_i32 : i32
    %9 = arith.remsi %arg0, %8 : i32
    %c0_i32_5 = arith.constant 0 : i32
    %10 = arith.cmpi ne, %9, %c0_i32_5 : i32
    %c0_i32_6 = arith.constant 0 : i32
    %11 = arith.cmpi slt, %9, %c0_i32_6 : i32
    %c0_i32_7 = arith.constant 0 : i32
    %12 = arith.cmpi slt, %8, %c0_i32_7 : i32
    %13 = arith.xori %11, %12 : i1
    %14 = arith.andi %13, %10 : i1
    %15 = arith.addi %9, %8 : i32
    %16 = arith.select %14, %15, %9 : i32
    %c0_i32_8 = arith.constant 0 : i32
    %c0_i32_9 = arith.constant 0 : i32
    %c0_i32_10 = arith.constant 0 : i32
    %17 = tpu.memref_slice %arg2[%c0_i32_9, %c0_i32_10] : memref<1000x128xf32, #tpu.memory_space<any>> -> memref<1x128xf32, #tpu.memory_space<any>>
    %c0_i32_11 = arith.constant 0 : i32
    %c0_i32_12 = arith.constant 0 : i32
    %18 = tpu.memref_slice %arg4[%16, %c0_i32_11, %c0_i32_12] : memref<2x16x128xf32, #tpu.memory_space<vmem>> -> memref<1x1x128xf32, #tpu.memory_space<vmem>>
    %19 = tpu.memref_squeeze %18 : memref<1x1x128xf32, #tpu.memory_space<vmem>> -> memref<1x128xf32, #tpu.memory_space<vmem>>
    %20 = tpu.memref_slice %arg5[%16, %c0_i32_8] : memref<2x16x!tpu.dma_semaphore, #tpu.memory_space<semaphore_mem>> -> memref<1x1x!tpu.dma_semaphore, #tpu.memory_space<semaphore_mem>>
    %21 = tpu.memref_squeeze %20 : memref<1x1x!tpu.dma_semaphore, #tpu.memory_space<semaphore_mem>> -> memref<!tpu.dma_semaphore, #tpu.memory_space<semaphore_mem>>
    tpu.wait_dma2 semaphore(%21 : memref<!tpu.dma_semaphore, #tpu.memory_space<semaphore_mem>>) src(%17 : memref<1x128xf32, #tpu.memory_space<any>>) dst(%19 : memref<1x128xf32, #tpu.memory_space<vmem>>)
    %c1_i32_13 = arith.constant 1 : i32
    %c0_i32_14 = arith.constant 0 : i32
    %c0_i32_15 = arith.constant 0 : i32
    %22 = tpu.memref_slice %arg2[%c0_i32_14, %c0_i32_15] : memref<1000x128xf32, #tpu.memory_space<any>> -> memref<1x128xf32, #tpu.memory_space<any>>
    %c1_i32_16 = arith.constant 1 : i32
    %c0_i32_17 = arith.constant 0 : i32
    %23 = tpu.memref_slice %arg4[%16, %c1_i32_16, %c0_i32_17] : memref<2x16x128xf32, #tpu.memory_space<vmem>> -> memref<1x1x128xf32, #tpu.memory_space<vmem>>
    %24 = tpu.memref_squeeze %23 : memref<1x1x128xf32, #tpu.memory_space<vmem>> -> memref<1x128xf32, #tpu.memory_space<vmem>>
    %25 = tpu.memref_slice %arg5[%16, %c1_i32_13] : memref<2x16x!tpu.dma_semaphore, #tpu.memory_space<semaphore_mem>> -> memref<1x1x!tpu.dma_semaphore, #tpu.memory_space<semaphore_mem>>
    %26 = tpu.memref_squeeze %25 : memref<1x1x!tpu.dma_semaphore, #tpu.memory_space<semaphore_mem>> -> memref<!tpu.dma_semaphore, #tpu.memory_space<semaphore_mem>>
    tpu.wait_dma2 semaphore(%26 : memref<!tpu.dma_semaphore, #tpu.memory_space<semaphore_mem>>) src(%22 : memref<1x128xf32, #tpu.memory_space<any>>) dst(%24 : memref<1x128xf32, #tpu.memory_space<vmem>>)
    %c2_i32_18 = arith.constant 2 : i32
    %c0_i32_19 = arith.constant 0 : i32
    %c0_i32_20 = arith.constant 0 : i32
    %27 = tpu.memref_slice %arg2[%c0_i32_19, %c0_i32_20] : memref<1000x128xf32, #tpu.memory_space<any>> -> memref<1x128xf32, #tpu.memory_space<any>>
    %c2_i32_21 = arith.constant 2 : i32
    %c0_i32_22 = arith.constant 0 : i32
    %28 = tpu.memref_slice %arg4[%16, %c2_i32_21, %c0_i32_22] : memref<2x16x128xf32, #tpu.memory_space<vmem>> -> memref<1x1x128xf32, #tpu.memory_space<vmem>>
    %29 = tpu.memref_squeeze %28 : memref<1x1x128xf32, #tpu.memory_space<vmem>> -> memref<1x128xf32, #tpu.memory_space<vmem>>
    %30 = tpu.memref_slice %arg5[%16, %c2_i32_18] : memref<2x16x!tpu.dma_semaphore, #tpu.memory_space<semaphore_mem>> -> memref<1x1x!tpu.dma_semaphore, #tpu.memory_space<semaphore_mem>>
    %31 = tpu.memref_squeeze %30 : memref<1x1x!tpu.dma_semaphore, #tpu.memory_space<semaphore_mem>> -> memref<!tpu.dma_semaphore, #tpu.memory_space<semaphore_mem>>
    tpu.wait_dma2 semaphore(%31 : memref<!tpu.dma_semaphore, #tpu.memory_space<semaphore_mem>>) src(%27 : memref<1x128xf32, #tpu.memory_space<any>>) dst(%29 : memref<1x128xf32, #tpu.memory_space<vmem>>)
    %c3_i32 = arith.constant 3 : i32
    %c0_i32_23 = arith.constant 0 : i32
    %c0_i32_24 = arith.constant 0 : i32
    %32 = tpu.memref_slice %arg2[%c0_i32_23, %c0_i32_24] : memref<1000x128xf32, #tpu.memory_space<any>> -> memref<1x128xf32, #tpu.memory_space<any>>
    %c3_i32_25 = arith.constant 3 : i32
    %c0_i32_26 = arith.constant 0 : i32
    %33 = tpu.memref_slice %arg4[%16, %c3_i32_25, %c0_i32_26] : memref<2x16x128xf32, #tpu.memory_space<vmem>> -> memref<1x1x128xf32, #tpu.memory_space<vmem>>
    %34 = tpu.memref_squeeze %33 : memref<1x1x128xf32, #tpu.memory_space<vmem>> -> memref<1x128xf32, #tpu.memory_space<vmem>>
    %35 = tpu.memref_slice %arg5[%16, %c3_i32] : memref<2x16x!tpu.dma_semaphore, #tpu.memory_space<semaphore_mem>> -> memref<1x1x!tpu.dma_semaphore, #tpu.memory_space<semaphore_mem>>
    %36 = tpu.memref_squeeze %35 : memref<1x1x!tpu.dma_semaphore, #tpu.memory_space<semaphore_mem>> -> memref<!tpu.dma_semaphore, #tpu.memory_space<semaphore_mem>>
    tpu.wait_dma2 semaphore(%36 : memref<!tpu.dma_semaphore, #tpu.memory_space<semaphore_mem>>) src(%32 : memref<1x128xf32, #tpu.memory_space<any>>) dst(%34 : memref<1x128xf32, #tpu.memory_space<vmem>>)
    %c4_i32 = arith.constant 4 : i32
    %c0_i32_27 = arith.constant 0 : i32
    %c0_i32_28 = arith.constant 0 : i32
    %37 = tpu.memref_slice %arg2[%c0_i32_27, %c0_i32_28] : memref<1000x128xf32, #tpu.memory_space<any>> -> memref<1x128xf32, #tpu.memory_space<any>>
    %c4_i32_29 = arith.constant 4 : i32
    %c0_i32_30 = arith.constant 0 : i32
    %38 = tpu.memref_slice %arg4[%16, %c4_i32_29, %c0_i32_30] : memref<2x16x128xf32, #tpu.memory_space<vmem>> -> memref<1x1x128xf32, #tpu.memory_space<vmem>>
    %39 = tpu.memref_squeeze %38 : memref<1x1x128xf32, #tpu.memory_space<vmem>> -> memref<1x128xf32, #tpu.memory_space<vmem>>
    %40 = tpu.memref_slice %arg5[%16, %c4_i32] : memref<2x16x!tpu.dma_semaphore, #tpu.memory_space<semaphore_mem>> -> memref<1x1x!tpu.dma_semaphore, #tpu.memory_space<semaphore_mem>>
    %41 = tpu.memref_squeeze %40 : memref<1x1x!tpu.dma_semaphore, #tpu.memory_space<semaphore_mem>> -> memref<!tpu.dma_semaphore, #tpu.memory_space<semaphore_mem>>
    tpu.wait_dma2 semaphore(%41 : memref<!tpu.dma_semaphore, #tpu.memory_space<semaphore_mem>>) src(%37 : memref<1x128xf32, #tpu.memory_space<any>>) dst(%39 : memref<1x128xf32, #tpu.memory_space<vmem>>)
    %c5_i32 = arith.constant 5 : i32
    %c0_i32_31 = arith.constant 0 : i32
    %c0_i32_32 = arith.constant 0 : i32
    %42 = tpu.memref_slice %arg2[%c0_i32_31, %c0_i32_32] : memref<1000x128xf32, #tpu.memory_space<any>> -> memref<1x128xf32, #tpu.memory_space<any>>
    %c5_i32_33 = arith.constant 5 : i32
    %c0_i32_34 = arith.constant 0 : i32
    %43 = tpu.memref_slice %arg4[%16, %c5_i32_33, %c0_i32_34] : memref<2x16x128xf32, #tpu.memory_space<vmem>> -> memref<1x1x128xf32, #tpu.memory_space<vmem>>
    %44 = tpu.memref_squeeze %43 : memref<1x1x128xf32, #tpu.memory_space<vmem>> -> memref<1x128xf32, #tpu.memory_space<vmem>>
    %45 = tpu.memref_slice %arg5[%16, %c5_i32] : memref<2x16x!tpu.dma_semaphore, #tpu.memory_space<semaphore_mem>> -> memref<1x1x!tpu.dma_semaphore, #tpu.memory_space<semaphore_mem>>
    %46 = tpu.memref_squeeze %45 : memref<1x1x!tpu.dma_semaphore, #tpu.memory_space<semaphore_mem>> -> memref<!tpu.dma_semaphore, #tpu.memory_space<semaphore_mem>>
    tpu.wait_dma2 semaphore(%46 : memref<!tpu.dma_semaphore, #tpu.memory_space<semaphore_mem>>) src(%42 : memref<1x128xf32, #tpu.memory_space<any>>) dst(%44 : memref<1x128xf32, #tpu.memory_space<vmem>>)
    %c6_i32 = arith.constant 6 : i32
    %c0_i32_35 = arith.constant 0 : i32
    %c0_i32_36 = arith.constant 0 : i32
    %47 = tpu.memref_slice %arg2[%c0_i32_35, %c0_i32_36] : memref<1000x128xf32, #tpu.memory_space<any>> -> memref<1x128xf32, #tpu.memory_space<any>>
    %c6_i32_37 = arith.constant 6 : i32
    %c0_i32_38 = arith.constant 0 : i32
    %48 = tpu.memref_slice %arg4[%16, %c6_i32_37, %c0_i32_38] : memref<2x16x128xf32, #tpu.memory_space<vmem>> -> memref<1x1x128xf32, #tpu.memory_space<vmem>>
    %49 = tpu.memref_squeeze %48 : memref<1x1x128xf32, #tpu.memory_space<vmem>> -> memref<1x128xf32, #tpu.memory_space<vmem>>
    %50 = tpu.memref_slice %arg5[%16, %c6_i32] : memref<2x16x!tpu.dma_semaphore, #tpu.memory_space<semaphore_mem>> -> memref<1x1x!tpu.dma_semaphore, #tpu.memory_space<semaphore_mem>>
    %51 = tpu.memref_squeeze %50 : memref<1x1x!tpu.dma_semaphore, #tpu.memory_space<semaphore_mem>> -> memref<!tpu.dma_semaphore, #tpu.memory_space<semaphore_mem>>
    tpu.wait_dma2 semaphore(%51 : memref<!tpu.dma_semaphore, #tpu.memory_space<semaphore_mem>>) src(%47 : memref<1x128xf32, #tpu.memory_space<any>>) dst(%49 : memref<1x128xf32, #tpu.memory_space<vmem>>)
    %c7_i32 = arith.constant 7 : i32
    %c0_i32_39 = arith.constant 0 : i32
    %c0_i32_40 = arith.constant 0 : i32
    %52 = tpu.memref_slice %arg2[%c0_i32_39, %c0_i32_40] : memref<1000x128xf32, #tpu.memory_space<any>> -> memref<1x128xf32, #tpu.memory_space<any>>
    %c7_i32_41 = arith.constant 7 : i32
    %c0_i32_42 = arith.constant 0 : i32
    %53 = tpu.memref_slice %arg4[%16, %c7_i32_41, %c0_i32_42] : memref<2x16x128xf32, #tpu.memory_space<vmem>> -> memref<1x1x128xf32, #tpu.memory_space<vmem>>
    %54 = tpu.memref_squeeze %53 : memref<1x1x128xf32, #tpu.memory_space<vmem>> -> memref<1x128xf32, #tpu.memory_space<vmem>>
    %55 = tpu.memref_slice %arg5[%16, %c7_i32] : memref<2x16x!tpu.dma_semaphore, #tpu.memory_space<semaphore_mem>> -> memref<1x1x!tpu.dma_semaphore, #tpu.memory_space<semaphore_mem>>
    %56 = tpu.memref_squeeze %55 : memref<1x1x!tpu.dma_semaphore, #tpu.memory_space<semaphore_mem>> -> memref<!tpu.dma_semaphore, #tpu.memory_space<semaphore_mem>>
    tpu.wait_dma2 semaphore(%56 : memref<!tpu.dma_semaphore, #tpu.memory_space<semaphore_mem>>) src(%52 : memref<1x128xf32, #tpu.memory_space<any>>) dst(%54 : memref<1x128xf32, #tpu.memory_space<vmem>>)
    %c8_i32 = arith.constant 8 : i32
    %c0_i32_43 = arith.constant 0 : i32
    %c0_i32_44 = arith.constant 0 : i32
    %57 = tpu.memref_slice %arg2[%c0_i32_43, %c0_i32_44] : memref<1000x128xf32, #tpu.memory_space<any>> -> memref<1x128xf32, #tpu.memory_space<any>>
    %c8_i32_45 = arith.constant 8 : i32
    %c0_i32_46 = arith.constant 0 : i32
    %58 = tpu.memref_slice %arg4[%16, %c8_i32_45, %c0_i32_46] : memref<2x16x128xf32, #tpu.memory_space<vmem>> -> memref<1x1x128xf32, #tpu.memory_space<vmem>>
    %59 = tpu.memref_squeeze %58 : memref<1x1x128xf32, #tpu.memory_space<vmem>> -> memref<1x128xf32, #tpu.memory_space<vmem>>
    %60 = tpu.memref_slice %arg5[%16, %c8_i32] : memref<2x16x!tpu.dma_semaphore, #tpu.memory_space<semaphore_mem>> -> memref<1x1x!tpu.dma_semaphore, #tpu.memory_space<semaphore_mem>>
    %61 = tpu.memref_squeeze %60 : memref<1x1x!tpu.dma_semaphore, #tpu.memory_space<semaphore_mem>> -> memref<!tpu.dma_semaphore, #tpu.memory_space<semaphore_mem>>
    tpu.wait_dma2 semaphore(%61 : memref<!tpu.dma_semaphore, #tpu.memory_space<semaphore_mem>>) src(%57 : memref<1x128xf32, #tpu.memory_space<any>>) dst(%59 : memref<1x128xf32, #tpu.memory_space<vmem>>)
    %c9_i32 = arith.constant 9 : i32
    %c0_i32_47 = arith.constant 0 : i32
    %c0_i32_48 = arith.constant 0 : i32
    %62 = tpu.memref_slice %arg2[%c0_i32_47, %c0_i32_48] : memref<1000x128xf32, #tpu.memory_space<any>> -> memref<1x128xf32, #tpu.memory_space<any>>
    %c9_i32_49 = arith.constant 9 : i32
    %c0_i32_50 = arith.constant 0 : i32
    %63 = tpu.memref_slice %arg4[%16, %c9_i32_49, %c0_i32_50] : memref<2x16x128xf32, #tpu.memory_space<vmem>> -> memref<1x1x128xf32, #tpu.memory_space<vmem>>
    %64 = tpu.memref_squeeze %63 : memref<1x1x128xf32, #tpu.memory_space<vmem>> -> memref<1x128xf32, #tpu.memory_space<vmem>>
    %65 = tpu.memref_slice %arg5[%16, %c9_i32] : memref<2x16x!tpu.dma_semaphore, #tpu.memory_space<semaphore_mem>> -> memref<1x1x!tpu.dma_semaphore, #tpu.memory_space<semaphore_mem>>
    %66 = tpu.memref_squeeze %65 : memref<1x1x!tpu.dma_semaphore, #tpu.memory_space<semaphore_mem>> -> memref<!tpu.dma_semaphore, #tpu.memory_space<semaphore_mem>>
    tpu.wait_dma2 semaphore(%66 : memref<!tpu.dma_semaphore, #tpu.memory_space<semaphore_mem>>) src(%62 : memref<1x128xf32, #tpu.memory_space<any>>) dst(%64 : memref<1x128xf32, #tpu.memory_space<vmem>>)
    %c10_i32 = arith.constant 10 : i32
    %c0_i32_51 = arith.constant 0 : i32
    %c0_i32_52 = arith.constant 0 : i32
    %67 = tpu.memref_slice %arg2[%c0_i32_51, %c0_i32_52] : memref<1000x128xf32, #tpu.memory_space<any>> -> memref<1x128xf32, #tpu.memory_space<any>>
    %c10_i32_53 = arith.constant 10 : i32
    %c0_i32_54 = arith.constant 0 : i32
    %68 = tpu.memref_slice %arg4[%16, %c10_i32_53, %c0_i32_54] : memref<2x16x128xf32, #tpu.memory_space<vmem>> -> memref<1x1x128xf32, #tpu.memory_space<vmem>>
    %69 = tpu.memref_squeeze %68 : memref<1x1x128xf32, #tpu.memory_space<vmem>> -> memref<1x128xf32, #tpu.memory_space<vmem>>
    %70 = tpu.memref_slice %arg5[%16, %c10_i32] : memref<2x16x!tpu.dma_semaphore, #tpu.memory_space<semaphore_mem>> -> memref<1x1x!tpu.dma_semaphore, #tpu.memory_space<semaphore_mem>>
    %71 = tpu.memref_squeeze %70 : memref<1x1x!tpu.dma_semaphore, #tpu.memory_space<semaphore_mem>> -> memref<!tpu.dma_semaphore, #tpu.memory_space<semaphore_mem>>
    tpu.wait_dma2 semaphore(%71 : memref<!tpu.dma_semaphore, #tpu.memory_space<semaphore_mem>>) src(%67 : memref<1x128xf32, #tpu.memory_space<any>>) dst(%69 : memref<1x128xf32, #tpu.memory_space<vmem>>)
    %c11_i32 = arith.constant 11 : i32
    %c0_i32_55 = arith.constant 0 : i32
    %c0_i32_56 = arith.constant 0 : i32
    %72 = tpu.memref_slice %arg2[%c0_i32_55, %c0_i32_56] : memref<1000x128xf32, #tpu.memory_space<any>> -> memref<1x128xf32, #tpu.memory_space<any>>
    %c11_i32_57 = arith.constant 11 : i32
    %c0_i32_58 = arith.constant 0 : i32
    %73 = tpu.memref_slice %arg4[%16, %c11_i32_57, %c0_i32_58] : memref<2x16x128xf32, #tpu.memory_space<vmem>> -> memref<1x1x128xf32, #tpu.memory_space<vmem>>
    %74 = tpu.memref_squeeze %73 : memref<1x1x128xf32, #tpu.memory_space<vmem>> -> memref<1x128xf32, #tpu.memory_space<vmem>>
    %75 = tpu.memref_slice %arg5[%16, %c11_i32] : memref<2x16x!tpu.dma_semaphore, #tpu.memory_space<semaphore_mem>> -> memref<1x1x!tpu.dma_semaphore, #tpu.memory_space<semaphore_mem>>
    %76 = tpu.memref_squeeze %75 : memref<1x1x!tpu.dma_semaphore, #tpu.memory_space<semaphore_mem>> -> memref<!tpu.dma_semaphore, #tpu.memory_space<semaphore_mem>>
    tpu.wait_dma2 semaphore(%76 : memref<!tpu.dma_semaphore, #tpu.memory_space<semaphore_mem>>) src(%72 : memref<1x128xf32, #tpu.memory_space<any>>) dst(%74 : memref<1x128xf32, #tpu.memory_space<vmem>>)
    %c12_i32 = arith.constant 12 : i32
    %c0_i32_59 = arith.constant 0 : i32
    %c0_i32_60 = arith.constant 0 : i32
    %77 = tpu.memref_slice %arg2[%c0_i32_59, %c0_i32_60] : memref<1000x128xf32, #tpu.memory_space<any>> -> memref<1x128xf32, #tpu.memory_space<any>>
    %c12_i32_61 = arith.constant 12 : i32
    %c0_i32_62 = arith.constant 0 : i32
    %78 = tpu.memref_slice %arg4[%16, %c12_i32_61, %c0_i32_62] : memref<2x16x128xf32, #tpu.memory_space<vmem>> -> memref<1x1x128xf32, #tpu.memory_space<vmem>>
    %79 = tpu.memref_squeeze %78 : memref<1x1x128xf32, #tpu.memory_space<vmem>> -> memref<1x128xf32, #tpu.memory_space<vmem>>
    %80 = tpu.memref_slice %arg5[%16, %c12_i32] : memref<2x16x!tpu.dma_semaphore, #tpu.memory_space<semaphore_mem>> -> memref<1x1x!tpu.dma_semaphore, #tpu.memory_space<semaphore_mem>>
    %81 = tpu.memref_squeeze %80 : memref<1x1x!tpu.dma_semaphore, #tpu.memory_space<semaphore_mem>> -> memref<!tpu.dma_semaphore, #tpu.memory_space<semaphore_mem>>
    tpu.wait_dma2 semaphore(%81 : memref<!tpu.dma_semaphore, #tpu.memory_space<semaphore_mem>>) src(%77 : memref<1x128xf32, #tpu.memory_space<any>>) dst(%79 : memref<1x128xf32, #tpu.memory_space<vmem>>)
    %c13_i32 = arith.constant 13 : i32
    %c0_i32_63 = arith.constant 0 : i32
    %c0_i32_64 = arith.constant 0 : i32
    %82 = tpu.memref_slice %arg2[%c0_i32_63, %c0_i32_64] : memref<1000x128xf32, #tpu.memory_space<any>> -> memref<1x128xf32, #tpu.memory_space<any>>
    %c13_i32_65 = arith.constant 13 : i32
    %c0_i32_66 = arith.constant 0 : i32
    %83 = tpu.memref_slice %arg4[%16, %c13_i32_65, %c0_i32_66] : memref<2x16x128xf32, #tpu.memory_space<vmem>> -> memref<1x1x128xf32, #tpu.memory_space<vmem>>
    %84 = tpu.memref_squeeze %83 : memref<1x1x128xf32, #tpu.memory_space<vmem>> -> memref<1x128xf32, #tpu.memory_space<vmem>>
    %85 = tpu.memref_slice %arg5[%16, %c13_i32] : memref<2x16x!tpu.dma_semaphore, #tpu.memory_space<semaphore_mem>> -> memref<1x1x!tpu.dma_semaphore, #tpu.memory_space<semaphore_mem>>
    %86 = tpu.memref_squeeze %85 : memref<1x1x!tpu.dma_semaphore, #tpu.memory_space<semaphore_mem>> -> memref<!tpu.dma_semaphore, #tpu.memory_space<semaphore_mem>>
    tpu.wait_dma2 semaphore(%86 : memref<!tpu.dma_semaphore, #tpu.memory_space<semaphore_mem>>) src(%82 : memref<1x128xf32, #tpu.memory_space<any>>) dst(%84 : memref<1x128xf32, #tpu.memory_space<vmem>>)
    %c14_i32 = arith.constant 14 : i32
    %c0_i32_67 = arith.constant 0 : i32
    %c0_i32_68 = arith.constant 0 : i32
    %87 = tpu.memref_slice %arg2[%c0_i32_67, %c0_i32_68] : memref<1000x128xf32, #tpu.memory_space<any>> -> memref<1x128xf32, #tpu.memory_space<any>>
    %c14_i32_69 = arith.constant 14 : i32
    %c0_i32_70 = arith.constant 0 : i32
    %88 = tpu.memref_slice %arg4[%16, %c14_i32_69, %c0_i32_70] : memref<2x16x128xf32, #tpu.memory_space<vmem>> -> memref<1x1x128xf32, #tpu.memory_space<vmem>>
    %89 = tpu.memref_squeeze %88 : memref<1x1x128xf32, #tpu.memory_space<vmem>> -> memref<1x128xf32, #tpu.memory_space<vmem>>
    %90 = tpu.memref_slice %arg5[%16, %c14_i32] : memref<2x16x!tpu.dma_semaphore, #tpu.memory_space<semaphore_mem>> -> memref<1x1x!tpu.dma_semaphore, #tpu.memory_space<semaphore_mem>>
    %91 = tpu.memref_squeeze %90 : memref<1x1x!tpu.dma_semaphore, #tpu.memory_space<semaphore_mem>> -> memref<!tpu.dma_semaphore, #tpu.memory_space<semaphore_mem>>
    tpu.wait_dma2 semaphore(%91 : memref<!tpu.dma_semaphore, #tpu.memory_space<semaphore_mem>>) src(%87 : memref<1x128xf32, #tpu.memory_space<any>>) dst(%89 : memref<1x128xf32, #tpu.memory_space<vmem>>)
    %c15_i32 = arith.constant 15 : i32
    %c0_i32_71 = arith.constant 0 : i32
    %c0_i32_72 = arith.constant 0 : i32
    %92 = tpu.memref_slice %arg2[%c0_i32_71, %c0_i32_72] : memref<1000x128xf32, #tpu.memory_space<any>> -> memref<1x128xf32, #tpu.memory_space<any>>
    %c15_i32_73 = arith.constant 15 : i32
    %c0_i32_74 = arith.constant 0 : i32
    %93 = tpu.memref_slice %arg4[%16, %c15_i32_73, %c0_i32_74] : memref<2x16x128xf32, #tpu.memory_space<vmem>> -> memref<1x1x128xf32, #tpu.memory_space<vmem>>
    %94 = tpu.memref_squeeze %93 : memref<1x1x128xf32, #tpu.memory_space<vmem>> -> memref<1x128xf32, #tpu.memory_space<vmem>>
    %95 = tpu.memref_slice %arg5[%16, %c15_i32] : memref<2x16x!tpu.dma_semaphore, #tpu.memory_space<semaphore_mem>> -> memref<1x1x!tpu.dma_semaphore, #tpu.memory_space<semaphore_mem>>
    %96 = tpu.memref_squeeze %95 : memref<1x1x!tpu.dma_semaphore, #tpu.memory_space<semaphore_mem>> -> memref<!tpu.dma_semaphore, #tpu.memory_space<semaphore_mem>>
    tpu.wait_dma2 semaphore(%96 : memref<!tpu.dma_semaphore, #tpu.memory_space<semaphore_mem>>) src(%92 : memref<1x128xf32, #tpu.memory_space<any>>) dst(%94 : memref<1x128xf32, #tpu.memory_space<vmem>>)
    %97 = arith.index_cast %16 : i32 to index
    %c0 = arith.constant 0 : index
    %c0_75 = arith.constant 0 : index
    %98 = vector.load %arg4[%97, %c0, %c0_75] : memref<2x16x128xf32, #tpu.memory_space<vmem>>, vector<1x16x128xf32>
    %99 = vector.shape_cast %98 : vector<1x16x128xf32> to vector<16x128xf32>
    %cst = arith.constant 11.3137083 : f32
    %100 = vector.broadcast %cst : f32 to vector<16x128xf32>
    %101 = arith.mulf %99, %100 : vector<16x128xf32>
    %c0_76 = arith.constant 0 : index
    %c0_77 = arith.constant 0 : index
    %102 = vector.load %arg3[%c0_76, %c0_77] : memref<16x128xf32, #tpu.memory_space<vmem>>, vector<16x128xf32>
    tpu.vector_store %arg3[%c0_76, %c0_77], %101 {strides = array<i32>} : memref<16x128xf32, #tpu.memory_space<vmem>>, vector<16x128xf32>,
    return
  }
  func.func @transform_1(%arg0: i32, %arg1: memref<16xi32, #tpu.memory_space<smem>>) -> (i32, i32) {
    %c0_i32 = arith.constant 0 : i32
    %c0_i32_0 = arith.constant 0 : i32
    return %arg0, %c0_i32 : i32, i32
  }
}

</mosaic_0001>

<bundles_post_ra>
// kernel: tpu_custom_call.1
= control target key start
LH: loop header
LB: loop body
LE: loop exit
PB: predicated region body
PF: predicated region fallthrough
CT: control target
= control target key end

     0   :  { %s1990_s0 = inlined_call_operand.hbm [shape: s32[16], index: 0, kind: input, shape index: {}]   ;;  %s1991_s1 = inlined_call_operand.hbm [shape: f32[1000,128], index: 1, kind: input, shape index: {}]   ;;  %s1992_s2 = inlined_call_operand.hbm [shape: f32[16,128], index: 2, kind: output, shape index: {}]  }
   0x1   :  { %s1216_s11 = scalar_lea.hbm %s1990_s0, 16 }
   0x2   :  { %p1217_p0 = scmp.ne.s32.totalorder %s1990_s0, %s1216_s11  ;;  %p1220_p1 = scmp.lt.u32.totalorder %s1216_s11, %s1990_s0 }
   0x4   :  { %p1222_p2 = pnand %p1220_p1, %p1217_p0 }
   0x6   :  { %1225 = shalt.err (!%p1222_p2)  }
   0x7   :  { %s1668_s16 = smov [#allocation5]  }
   0x8   :  { %8 = dma.hbm_to_smem %s1990_s0, 16, %s1668_s16, [#allocation4] }
   0x9   :  { %1632 = dma.done.wait [#allocation4], 16 }
   0xa   :  { %1633 = vsyncadd [#allocation4], 4294967280 }
   0xb   :  { %10 = sfence }
   0xc   :  { %11 = vsyncpa [#allocation7], 0  ;;  %s16_s19 = sld [smem:[#allocation5]]  ;;  %s1669_s20 = smov [#allocation2]  }
   0xd   :  { %s26_s21 = sshll.u32 %s1669_s20, 4  ;;  %s1715_s22 = sld [smem:[#allocation5 + $0x1]]  ;;  %s1717_s21 = int_to_ptr.vmem [resolvable:$true] %s26_s21 }
   0xe   :  { %s1670_s23 = smov [#allocation2 + $0x1]   ;;  %s1719_s25 = sld [smem:[#allocation5 + $0x2]] }
   0xf   :  { %s42_s24 = sshll.u32 %s1670_s23, 4  ;;  %s1671_s26 = smov [#allocation2 + $0x2]   ;;  %s1721_s24 = int_to_ptr.vmem [resolvable:$true] %s42_s24 }
  0x10   :  { %s58_s0 = sshll.u32 %s1671_s26, 4  ;;  %s1723_s27 = sld [smem:[#allocation5 + $0x3]]  ;;  %s1725_s0 = int_to_ptr.vmem [resolvable:$true] %s58_s0 }
  0x11   :  { %s1734_s8 = scalar_lea.hbm %s1991_s1, 16000 }
  0x12   :  { %s1101_s28 = sshll.u32 %s16_s19, 4 }
  0x13   :  { %s18_s3 = scalar_lea.hbm %s1991_s1, %s1101_s28  ;;  %s1103_s4 = sshll.u32 %s1715_s22, 4 }
  0x14   :  { %s1226_s5 = scalar_lea.hbm %s18_s3, 16  ;;  %p1229_p4 = scmp.lt.u32.totalorder %s18_s3, %s1991_s1 }
  0x15   :  { %p1227_p3 = scmp.ne.s32.totalorder %s18_s3, %s1226_s5  ;;  %p1230_p5 = scmp.lt.u32.totalorder %s1734_s8, %s1226_s5 }
  0x16   :  { %p1232_p7 = scmp.lt.u32.totalorder %s1226_s5, %s18_s3 }
  0x17   :  { %p1231_p6 = por %p1230_p5, %p1229_p4 }
  0x19   :  { %p1233_p8 = por %p1232_p7, %p1231_p6 }
  0x1b   :  { %p1234_p9 = pnand %p1233_p8, %p1227_p3 }
  0x1d   :  { %1237 = shalt.err (!%p1234_p9)  }
  0x1e   :  { %s1238_s11 = scalar_lea.vmem %s1717_s21, 16  ;;  %s1743_s12 = scalar_lea.vmem %s1717_s21, 512 }
  0x1f   :  { %p1239_p10 = scmp.ne.s32.totalorder %s1717_s21, %s1238_s11  ;;  %p1243_p11 = scmp.lt.s32.totalorder %s1717_s21, %s1717_s21 }
  0x20   :  { %p1244_p12 = scmp.lt.s32.totalorder %s1743_s12, %s1238_s11 }
  0x22   :  { %p1245_p13 = por %p1244_p12, %p1243_p11 }
  0x24   :  { %p1246_p0 = pnand %p1245_p13, %p1239_p10 }
  0x26   :  { %1249 = shalt.err (!%p1246_p0)  }
  0x27   :  { %29 = dma.hbm_to_vmem [thread:$0]  %s18_s3, 16, %s1717_s21, [#allocation3] }
  0x28   :  { %s32_s15 = scalar_lea.hbm %s1991_s1, %s1103_s4  ;;  %s1105_s16 = sshll.u32 %s1719_s25, 4 }
  0x29   :  { %s1250_s17 = scalar_lea.hbm %s32_s15, 16  ;;  %p1253_p2 = scmp.lt.u32.totalorder %s32_s15, %s1991_s1 }
  0x2a   :  { %p1251_p1 = scmp.ne.s32.totalorder %s32_s15, %s1250_s17  ;;  %p1254_p3 = scmp.lt.u32.totalorder %s1734_s8, %s1250_s17 }
  0x2b   :  { %p1256_p5 = scmp.lt.u32.totalorder %s1250_s17, %s32_s15 }
  0x2c   :  { %p1255_p4 = por %p1254_p3, %p1253_p2 }
  0x2e   :  { %p1257_p6 = por %p1256_p5, %p1255_p4 }
  0x30   :  { %p1258_p7 = pnand %p1257_p6, %p1251_p1 }
  0x32   :  { %1261 = shalt.err (!%p1258_p7)  }
  0x33   :  { %s1262_s20 = scalar_lea.vmem %s1721_s24, 16  ;;  %p1267_p9 = scmp.lt.s32.totalorder %s1721_s24, %s1717_s21 }
  0x34   :  { %p1263_p8 = scmp.ne.s32.totalorder %s1721_s24, %s1262_s20  ;;  %p1268_p10 = scmp.lt.s32.totalorder %s1743_s12, %s1262_s20 }
  0x36   :  { %p1269_p11 = por %p1268_p10, %p1267_p9 }
  0x38   :  { %p1270_p12 = pnand %p1269_p11, %p1263_p8 }
  0x3a   :  { %1273 = shalt.err (!%p1270_p12)  }
  0x3b   :  { %45 = dma.hbm_to_vmem [thread:$0]  %s32_s15, 16, %s1721_s24, [#allocation3 + $0x1] }
  0x3c   :  { %s48_s25 = scalar_lea.hbm %s1991_s1, %s1105_s16  ;;  %s1107_s26 = sshll.u32 %s1723_s27, 4 }
  0x3d   :  { %s1274_s28 = scalar_lea.hbm %s48_s25, 16  ;;  %p1277_p0 = scmp.lt.u32.totalorder %s48_s25, %s1991_s1 }
  0x3e   :  { %p1275_p13 = scmp.ne.s32.totalorder %s48_s25, %s1274_s28  ;;  %p1278_p1 = scmp.lt.u32.totalorder %s1734_s8, %s1274_s28 }
  0x3f   :  { %p1280_p3 = scmp.lt.u32.totalorder %s1274_s28, %s48_s25 }
  0x40   :  { %p1279_p2 = por %p1278_p1, %p1277_p0 }
  0x42   :  { %p1281_p4 = por %p1280_p3, %p1279_p2 }
  0x44   :  { %p1282_p5 = pnand %p1281_p4, %p1275_p13 }
  0x46   :  { %1285 = shalt.err (!%p1282_p5)  }
  0x47   :  { %s1286_s24 = scalar_lea.vmem %s1725_s0, 16  ;;  %p1291_p7 = scmp.lt.s32.totalorder %s1725_s0, %s1717_s21 }
  0x48   :  { %p1287_p6 = scmp.ne.s32.totalorder %s1725_s0, %s1286_s24  ;;  %p1292_p8 = scmp.lt.s32.totalorder %s1743_s12, %s1286_s24 }
  0x4a   :  { %p1293_p9 = por %p1292_p8, %p1291_p7 }
  0x4c   :  { %p1294_p10 = pnand %p1293_p9, %p1287_p6 }
  0x4e   :  { %1297 = shalt.err (!%p1294_p10)  }
  0x4f   :  { %61 = dma.hbm_to_vmem [thread:$0]  %s48_s25, 16, %s1725_s0, [#allocation3 + $0x2] }
  0x50   :  { %s64_s4 = scalar_lea.hbm %s1991_s1, %s1107_s26  ;;  %s1672_s5 = smov [#allocation2 + $0x3]  }
  0x51   :  { %s74_s6 = sshll.u32 %s1672_s5, 4  ;;  %s1780_s7 = sld [smem:[#allocation5 + $0x4]]  ;;  %s75_s6 = int_to_ptr.vmem [resolvable:$true] %s74_s6 }
  0x52   :  { %s1298_s9 = scalar_lea.hbm %s64_s4, 16  ;;  %p1301_p12 = scmp.lt.u32.totalorder %s64_s4, %s1991_s1 }
  0x53   :  { %p1299_p11 = scmp.ne.s32.totalorder %s64_s4, %s1298_s9  ;;  %p1302_p13 = scmp.lt.u32.totalorder %s1734_s8, %s1298_s9 }
  0x54   :  { %p1304_p1 = scmp.lt.u32.totalorder %s1298_s9, %s64_s4 }
  0x55   :  { %p1303_p0 = por %p1302_p13, %p1301_p12 }
  0x57   :  { %p1305_p2 = por %p1304_p1, %p1303_p0 }
  0x59   :  { %p1306_p3 = pnand %p1305_p2, %p1299_p11 }
  0x5b   :  { %1309 = shalt.err (!%p1306_p3)  }
  0x5c   :  { %s1310_s0 = scalar_lea.vmem %s75_s6, 16  ;;  %p1315_p5 = scmp.lt.s32.totalorder %s75_s6, %s1717_s21 }
  0x5d   :  { %p1311_p4 = scmp.ne.s32.totalorder %s75_s6, %s1310_s0  ;;  %p1316_p6 = scmp.lt.s32.totalorder %s1743_s12, %s1310_s0 }
  0x5f   :  { %p1317_p7 = por %p1316_p6, %p1315_p5 }
  0x61   :  { %p1318_p8 = pnand %p1317_p7, %p1311_p4 }
  0x63   :  { %1321 = shalt.err (!%p1318_p8)  }
  0x64   :  { %77 = dma.hbm_to_vmem [thread:$0]  %s64_s4, 16, %s75_s6, [#allocation3 + $0x3] }
  0x65   :  { %s1673_s13 = smov [#allocation2 + $0x4]   ;;  %s1788_s15 = sld [smem:[#allocation5 + $0x5]] }
  0x66   :  { %s90_s14 = sshll.u32 %s1673_s13, 4  ;;  %s1674_s16 = smov [#allocation2 + $0x5]   ;;  %s91_s14 = int_to_ptr.vmem [resolvable:$true] %s90_s14 }
  0x67   :  { %s106_s17 = sshll.u32 %s1674_s16, 4  ;;  %s1790_s18 = sld [smem:[#allocation5 + $0x6]]  ;;  %s1793_s17 = int_to_ptr.vmem [resolvable:$true] %s106_s17 }
  0x68   :  { %s1109_s19 = sshll.u32 %s1780_s7, 4 }
  0x69   :  { %s80_s23 = scalar_lea.hbm %s1991_s1, %s1109_s19 }
  0x6a   :  { %s1322_s25 = scalar_lea.hbm %s80_s23, 16  ;;  %p1325_p10 = scmp.lt.u32.totalorder %s80_s23, %s1991_s1 }
  0x6b   :  { %p1323_p9 = scmp.ne.s32.totalorder %s80_s23, %s1322_s25  ;;  %p1326_p11 = scmp.lt.u32.totalorder %s1734_s8, %s1322_s25 }
  0x6c   :  { %p1328_p13 = scmp.lt.u32.totalorder %s1322_s25, %s80_s23 }
  0x6d   :  { %p1327_p12 = por %p1326_p11, %p1325_p10 }
  0x6f   :  { %p1329_p0 = por %p1328_p13, %p1327_p12 }
  0x71   :  { %p1330_p1 = pnand %p1329_p0, %p1323_p9 }
  0x73   :  { %1333 = shalt.err (!%p1330_p1)  }
  0x74   :  { %s1334_s29 = scalar_lea.vmem %s91_s14, 16  ;;  %p1339_p3 = scmp.lt.s32.totalorder %s91_s14, %s1717_s21 }
  0x75   :  { %p1335_p2 = scmp.ne.s32.totalorder %s91_s14, %s1334_s29  ;;  %p1340_p4 = scmp.lt.s32.totalorder %s1743_s12, %s1334_s29 }
  0x77   :  { %p1341_p5 = por %p1340_p4, %p1339_p3 }
  0x79   :  { %p1342_p6 = pnand %p1341_p5, %p1335_p2 }
  0x7b   :  { %1345 = shalt.err (!%p1342_p6)  }
  0x7c   :  { %93 = dma.hbm_to_vmem [thread:$0]  %s80_s23, 16, %s91_s14, [#allocation3 + $0x4] }
  0x7d   :  { %s1111_s30 = sshll.u32 %s1788_s15, 4  ;;  %s1675_s24 = smov [#allocation2 + $0x6]  }
  0x7e   :  { %s122_s27 = sshll.u32 %s1675_s24, 4  ;;  %s96_s5 = scalar_lea.hbm %s1991_s1, %s1111_s30  ;;  %s1808_s27 = int_to_ptr.vmem [resolvable:$true] %s122_s27 }
  0x7f   :  { %s1346_s6 = scalar_lea.hbm %s96_s5, 16  ;;  %p1349_p8 = scmp.lt.u32.totalorder %s96_s5, %s1991_s1 }
  0x80   :  { %p1347_p7 = scmp.ne.s32.totalorder %s96_s5, %s1346_s6  ;;  %p1350_p9 = scmp.lt.u32.totalorder %s1734_s8, %s1346_s6 }
  0x81   :  { %p1352_p11 = scmp.lt.u32.totalorder %s1346_s6, %s96_s5 }
  0x82   :  { %p1351_p10 = por %p1350_p9, %p1349_p8 }
  0x84   :  { %p1353_p12 = por %p1352_p11, %p1351_p10 }
  0x86   :  { %p1354_p13 = pnand %p1353_p12, %p1347_p7 }
  0x88   :  { %1357 = shalt.err (!%p1354_p13)  }
  0x89   :  { %s1358_s10 = scalar_lea.vmem %s1793_s17, 16  ;;  %p1363_p1 = scmp.lt.s32.totalorder %s1793_s17, %s1717_s21 }
  0x8a   :  { %p1359_p0 = scmp.ne.s32.totalorder %s1793_s17, %s1358_s10  ;;  %p1364_p2 = scmp.lt.s32.totalorder %s1743_s12, %s1358_s10 }
  0x8c   :  { %p1365_p3 = por %p1364_p2, %p1363_p1 }
  0x8e   :  { %p1366_p4 = pnand %p1365_p3, %p1359_p0 }
  0x90   :  { %1369 = shalt.err (!%p1366_p4)  }
  0x91   :  { %109 = dma.hbm_to_vmem [thread:$0]  %s96_s5, 16, %s1793_s17, [#allocation3 + $0x5] }
  0x92   :  { %s1113_s11 = sshll.u32 %s1790_s18, 4  ;;  %s1821_s0 = sld [smem:[#allocation5 + $0x7]] }
  0x93   :  { %s112_s15 = scalar_lea.hbm %s1991_s1, %s1113_s11 }
  0x94   :  { %s1370_s16 = scalar_lea.hbm %s112_s15, 16  ;;  %p1373_p6 = scmp.lt.u32.totalorder %s112_s15, %s1991_s1 }
  0x95   :  { %p1371_p5 = scmp.ne.s32.totalorder %s112_s15, %s1370_s16  ;;  %p1374_p7 = scmp.lt.u32.totalorder %s1734_s8, %s1370_s16 }
  0x96   :  { %p1376_p9 = scmp.lt.u32.totalorder %s1370_s16, %s112_s15 }
  0x97   :  { %p1375_p8 = por %p1374_p7, %p1373_p6 }
  0x99   :  { %p1377_p10 = por %p1376_p9, %p1375_p8 }
  0x9b   :  { %p1378_p11 = pnand %p1377_p10, %p1371_p5 }
  0x9d   :  { %1381 = shalt.err (!%p1378_p11)  }
  0x9e   :  { %s1382_s17 = scalar_lea.vmem %s1808_s27, 16  ;;  %p1387_p13 = scmp.lt.s32.totalorder %s1808_s27, %s1717_s21 }
  0x9f   :  { %p1383_p12 = scmp.ne.s32.totalorder %s1808_s27, %s1382_s17  ;;  %p1388_p0 = scmp.lt.s32.totalorder %s1743_s12, %s1382_s17 }
  0xa1   :  { %p1389_p1 = por %p1388_p0, %p1387_p13 }
  0xa3   :  { %p1390_p2 = pnand %p1389_p1, %p1383_p12 }
  0xa5   :  { %1393 = shalt.err (!%p1390_p2)  }
  0xa6   :  { %125 = dma.hbm_to_vmem [thread:$0]  %s112_s15, 16, %s1808_s27, [#allocation3 + $0x6] }
  0xa7   :  { %s1676_s18 = smov [#allocation2 + $0x7]   ;;  %s1836_s23 = sld [smem:[#allocation5 + $0x8]] }
  0xa8   :  { %s138_s22 = sshll.u32 %s1676_s18, 4  ;;  %s1677_s25 = smov [#allocation2 + $0x8]   ;;  %s139_s22 = int_to_ptr.vmem [resolvable:$true] %s138_s22 }
  0xa9   :  { %s154_s26 = sshll.u32 %s1677_s25, 4  ;;  %s1838_s28 = sld [smem:[#allocation5 + $0x9]]  ;;  %s1841_s26 = int_to_ptr.vmem [resolvable:$true] %s154_s26 }
  0xaa   :  { %s1115_s29 = sshll.u32 %s1821_s0, 4 }
  0xab   :  { %s128_s3 = scalar_lea.hbm %s1991_s1, %s1115_s29 }
  0xac   :  { %s1394_s4 = scalar_lea.hbm %s128_s3, 16  ;;  %p1397_p4 = scmp.lt.u32.totalorder %s128_s3, %s1991_s1 }
  0xad   :  { %p1395_p3 = scmp.ne.s32.totalorder %s128_s3, %s1394_s4  ;;  %p1398_p5 = scmp.lt.u32.totalorder %s1734_s8, %s1394_s4 }
  0xae   :  { %p1400_p7 = scmp.lt.u32.totalorder %s1394_s4, %s128_s3 }
  0xaf   :  { %p1399_p6 = por %p1398_p5, %p1397_p4 }
  0xb1   :  { %p1401_p8 = por %p1400_p7, %p1399_p6 }
  0xb3   :  { %p1402_p9 = pnand %p1401_p8, %p1395_p3 }
  0xb5   :  { %1405 = shalt.err (!%p1402_p9)  }
  0xb6   :  { %s1406_s6 = scalar_lea.vmem %s139_s22, 16  ;;  %p1411_p11 = scmp.lt.s32.totalorder %s139_s22, %s1717_s21 }
  0xb7   :  { %p1407_p10 = scmp.ne.s32.totalorder %s139_s22, %s1406_s6  ;;  %p1412_p12 = scmp.lt.s32.totalorder %s1743_s12, %s1406_s6 }
  0xb9   :  { %p1413_p13 = por %p1412_p12, %p1411_p11 }
  0xbb   :  { %p1414_p0 = pnand %p1413_p13, %p1407_p10 }
  0xbd   :  { %1417 = shalt.err (!%p1414_p0)  }
  0xbe   :  { %141 = dma.hbm_to_vmem [thread:$0]  %s128_s3, 16, %s139_s22, [#allocation3 + $0x7] }
  0xbf   :  { %s1117_s7 = sshll.u32 %s1836_s23, 4  ;;  %s1678_s9 = smov [#allocation2 + $0x9]  }
  0xc0   :  { %s170_s10 = sshll.u32 %s1678_s9, 4  ;;  %s144_s13 = scalar_lea.hbm %s1991_s1, %s1117_s7  ;;  %s1856_s10 = int_to_ptr.vmem [resolvable:$true] %s170_s10 }
  0xc1   :  { %s1418_s14 = scalar_lea.hbm %s144_s13, 16  ;;  %p1421_p2 = scmp.lt.u32.totalorder %s144_s13, %s1991_s1 }
  0xc2   :  { %p1419_p1 = scmp.ne.s32.totalorder %s144_s13, %s1418_s14  ;;  %p1422_p3 = scmp.lt.u32.totalorder %s1734_s8, %s1418_s14 }
  0xc3   :  { %p1424_p5 = scmp.lt.u32.totalorder %s1418_s14, %s144_s13 }
  0xc4   :  { %p1423_p4 = por %p1422_p3, %p1421_p2 }
  0xc6   :  { %p1425_p6 = por %p1424_p5, %p1423_p4 }
  0xc8   :  { %p1426_p7 = pnand %p1425_p6, %p1419_p1 }
  0xca   :  { %1429 = shalt.err (!%p1426_p7)  }
  0xcb   :  { %s1430_s19 = scalar_lea.vmem %s1841_s26, 16  ;;  %p1435_p9 = scmp.lt.s32.totalorder %s1841_s26, %s1717_s21 }
  0xcc   :  { %p1431_p8 = scmp.ne.s32.totalorder %s1841_s26, %s1430_s19  ;;  %p1436_p10 = scmp.lt.s32.totalorder %s1743_s12, %s1430_s19 }
  0xce   :  { %p1437_p11 = por %p1436_p10, %p1435_p9 }
  0xd0   :  { %p1438_p12 = pnand %p1437_p11, %p1431_p8 }
  0xd2   :  { %1441 = shalt.err (!%p1438_p12)  }
  0xd3   :  { %157 = dma.hbm_to_vmem [thread:$0]  %s144_s13, 16, %s1841_s26, [#allocation3 + $0x8] }
  0xd4   :  { %s1119_s20 = sshll.u32 %s1838_s28, 4  ;;  %s1869_s17 = sld [smem:[#allocation5 + $0xa]] }
  0xd5   :  { %s160_s23 = scalar_lea.hbm %s1991_s1, %s1119_s20 }
  0xd6   :  { %s1442_s25 = scalar_lea.hbm %s160_s23, 16  ;;  %p1445_p0 = scmp.lt.u32.totalorder %s160_s23, %s1991_s1 }
  0xd7   :  { %p1443_p13 = scmp.ne.s32.totalorder %s160_s23, %s1442_s25  ;;  %p1446_p1 = scmp.lt.u32.totalorder %s1734_s8, %s1442_s25 }
  0xd8   :  { %p1448_p3 = scmp.lt.u32.totalorder %s1442_s25, %s160_s23 }
  0xd9   :  { %p1447_p2 = por %p1446_p1, %p1445_p0 }
  0xdb   :  { %p1449_p4 = por %p1448_p3, %p1447_p2 }
  0xdd   :  { %p1450_p5 = pnand %p1449_p4, %p1443_p13 }
  0xdf   :  { %1453 = shalt.err (!%p1450_p5)  }
  0xe0   :  { %s1454_s26 = scalar_lea.vmem %s1856_s10, 16  ;;  %p1459_p7 = scmp.lt.s32.totalorder %s1856_s10, %s1717_s21 }
  0xe1   :  { %p1455_p6 = scmp.ne.s32.totalorder %s1856_s10, %s1454_s26  ;;  %p1460_p8 = scmp.lt.s32.totalorder %s1743_s12, %s1454_s26 }
  0xe3   :  { %p1461_p9 = por %p1460_p8, %p1459_p7 }
  0xe5   :  { %p1462_p10 = pnand %p1461_p9, %p1455_p6 }
  0xe7   :  { %1465 = shalt.err (!%p1462_p10)  }
  0xe8   :  { %173 = dma.hbm_to_vmem [thread:$0]  %s160_s23, 16, %s1856_s10, [#allocation3 + $0x9] }
  0xe9   :  { %s1679_s28 = smov [#allocation2 + $0xa]   ;;  %s1884_s3 = sld [smem:[#allocation5 + $0xb]] }
  0xea   :  { %s186_s24 = sshll.u32 %s1679_s28, 4  ;;  %s1680_s4 = smov [#allocation2 + $0xb]   ;;  %s187_s24 = int_to_ptr.vmem [resolvable:$true] %s186_s24 }
  0xeb   :  { %s202_s5 = sshll.u32 %s1680_s4, 4  ;;  %s1886_s27 = sld [smem:[#allocation5 + $0xc]]  ;;  %s1889_s5 = int_to_ptr.vmem [resolvable:$true] %s202_s5 }
  0xec   :  { %s1121_s6 = sshll.u32 %s1869_s17, 4 }
  0xed   :  { %s176_s11 = scalar_lea.hbm %s1991_s1, %s1121_s6 }
  0xee   :  { %s1466_s0 = scalar_lea.hbm %s176_s11, 16  ;;  %p1469_p12 = scmp.lt.u32.totalorder %s176_s11, %s1991_s1 }
  0xef   :  { %p1467_p11 = scmp.ne.s32.totalorder %s176_s11, %s1466_s0  ;;  %p1470_p13 = scmp.lt.u32.totalorder %s1734_s8, %s1466_s0 }
  0xf0   :  { %p1472_p1 = scmp.lt.u32.totalorder %s1466_s0, %s176_s11 }
  0xf1   :  { %p1471_p0 = por %p1470_p13, %p1469_p12 }
  0xf3   :  { %p1473_p2 = por %p1472_p1, %p1471_p0 }
  0xf5   :  { %p1474_p3 = pnand %p1473_p2, %p1467_p11 }
  0xf7   :  { %1477 = shalt.err (!%p1474_p3)  }
  0xf8   :  { %s1478_s14 = scalar_lea.vmem %s187_s24, 16  ;;  %p1483_p5 = scmp.lt.s32.totalorder %s187_s24, %s1717_s21 }
  0xf9   :  { %p1479_p4 = scmp.ne.s32.totalorder %s187_s24, %s1478_s14  ;;  %p1484_p6 = scmp.lt.s32.totalorder %s1743_s12, %s1478_s14 }
  0xfb   :  { %p1485_p7 = por %p1484_p6, %p1483_p5 }
  0xfd   :  { %p1486_p8 = pnand %p1485_p7, %p1479_p4 }
  0xff   :  { %1489 = shalt.err (!%p1486_p8)  }
 0x100   :  { %189 = dma.hbm_to_vmem [thread:$0]  %s176_s11, 16, %s187_s24, [#allocation3 + $0xa] }
 0x101   :  { %s1123_s15 = sshll.u32 %s1884_s3, 4  ;;  %s1681_s16 = smov [#allocation2 + $0xc]  }
 0x102   :  { %s218_s19 = sshll.u32 %s1681_s16, 4  ;;  %s192_s18 = scalar_lea.hbm %s1991_s1, %s1123_s15  ;;  %s1904_s19 = int_to_ptr.vmem [resolvable:$true] %s218_s19 }
 0x103   :  { %s1490_s22 = scalar_lea.hbm %s192_s18, 16  ;;  %p1493_p10 = scmp.lt.u32.totalorder %s192_s18, %s1991_s1 }
 0x104   :  { %p1491_p9 = scmp.ne.s32.totalorder %s192_s18, %s1490_s22  ;;  %p1494_p11 = scmp.lt.u32.totalorder %s1734_s8, %s1490_s22 }
 0x105   :  { %p1496_p13 = scmp.lt.u32.totalorder %s1490_s22, %s192_s18 }
 0x106   :  { %p1495_p12 = por %p1494_p11, %p1493_p10 }
 0x108   :  { %p1497_p0 = por %p1496_p13, %p1495_p12 }
 0x10a   :  { %p1498_p1 = pnand %p1497_p0, %p1491_p9 }
 0x10c   :  { %1501 = shalt.err (!%p1498_p1)  }
 0x10d   :  { %s1502_s29 = scalar_lea.vmem %s1889_s5, 16  ;;  %p1507_p3 = scmp.lt.s32.totalorder %s1889_s5, %s1717_s21 }
 0x10e   :  { %p1503_p2 = scmp.ne.s32.totalorder %s1889_s5, %s1502_s29  ;;  %p1508_p4 = scmp.lt.s32.totalorder %s1743_s12, %s1502_s29 }
 0x110   :  { %p1509_p5 = por %p1508_p4, %p1507_p3 }
 0x112   :  { %p1510_p6 = pnand %p1509_p5, %p1503_p2 }
 0x114   :  { %1513 = shalt.err (!%p1510_p6)  }
 0x115   :  { %205 = dma.hbm_to_vmem [thread:$0]  %s192_s18, 16, %s1889_s5, [#allocation3 + $0xb] }
 0x116   :  { %s1125_s30 = sshll.u32 %s1886_s27, 4  ;;  %s1917_s26 = sld [smem:[#allocation5 + $0xd]] }
 0x117   :  { %s208_s3 = scalar_lea.hbm %s1991_s1, %s1125_s30 }
 0x118   :  { %s1514_s4 = scalar_lea.hbm %s208_s3, 16  ;;  %p1517_p8 = scmp.lt.u32.totalorder %s208_s3, %s1991_s1 }
 0x119   :  { %p1515_p7 = scmp.ne.s32.totalorder %s208_s3, %s1514_s4  ;;  %p1518_p9 = scmp.lt.u32.totalorder %s1734_s8, %s1514_s4 }
 0x11a   :  { %p1520_p11 = scmp.lt.u32.totalorder %s1514_s4, %s208_s3 }
 0x11b   :  { %p1519_p10 = por %p1518_p9, %p1517_p8 }
 0x11d   :  { %p1521_p12 = por %p1520_p11, %p1519_p10 }
 0x11f   :  { %p1522_p13 = pnand %p1521_p12, %p1515_p7 }
 0x121   :  { %1525 = shalt.err (!%p1522_p13)  }
 0x122   :  { %s1526_s5 = scalar_lea.vmem %s1904_s19, 16  ;;  %p1531_p1 = scmp.lt.s32.totalorder %s1904_s19, %s1717_s21 }
 0x123   :  { %p1527_p0 = scmp.ne.s32.totalorder %s1904_s19, %s1526_s5  ;;  %p1532_p2 = scmp.lt.s32.totalorder %s1743_s12, %s1526_s5 }
 0x125   :  { %p1533_p3 = por %p1532_p2, %p1531_p1 }
 0x127   :  { %p1534_p4 = pnand %p1533_p3, %p1527_p0 }
 0x129   :  { %1537 = shalt.err (!%p1534_p4)  }
 0x12a   :  { %221 = dma.hbm_to_vmem [thread:$0]  %s208_s3, 16, %s1904_s19, [#allocation3 + $0xc] }
 0x12b   :  { %s1682_s27 = smov [#allocation2 + $0xd]   ;;  %s1932_s11 = sld [smem:[#allocation5 + $0xe]] }
 0x12c   :  { %s234_s9 = sshll.u32 %s1682_s27, 4  ;;  %s1683_s0 = smov [#allocation2 + $0xe]   ;;  %s235_s9 = int_to_ptr.vmem [resolvable:$true] %s234_s9 }
 0x12d   :  { %s250_s13 = sshll.u32 %s1683_s0, 4  ;;  %s1934_s10 = sld [smem:[#allocation5 + $0xf]]  ;;  %s1937_s13 = int_to_ptr.vmem [resolvable:$true] %s250_s13 }
 0x12e   :  { %s1127_s14 = sshll.u32 %s1917_s26, 4 }
 0x12f   :  { %s224_s20 = scalar_lea.hbm %s1991_s1, %s1127_s14 }
 0x130   :  { %s1538_s17 = scalar_lea.hbm %s224_s20, 16  ;;  %p1541_p6 = scmp.lt.u32.totalorder %s224_s20, %s1991_s1 }
 0x131   :  { %p1539_p5 = scmp.ne.s32.totalorder %s224_s20, %s1538_s17  ;;  %p1542_p7 = scmp.lt.u32.totalorder %s1734_s8, %s1538_s17 }
 0x132   :  { %p1544_p9 = scmp.lt.u32.totalorder %s1538_s17, %s224_s20 }
 0x133   :  { %p1543_p8 = por %p1542_p7, %p1541_p6 }
 0x135   :  { %p1545_p10 = por %p1544_p9, %p1543_p8 }
 0x137   :  { %p1546_p11 = pnand %p1545_p10, %p1539_p5 }
 0x139   :  { %1549 = shalt.err (!%p1546_p11)  }
 0x13a   :  { %s1550_s22 = scalar_lea.vmem %s235_s9, 16  ;;  %p1555_p13 = scmp.lt.s32.totalorder %s235_s9, %s1717_s21 }
 0x13b   :  { %p1551_p12 = scmp.ne.s32.totalorder %s235_s9, %s1550_s22  ;;  %p1556_p0 = scmp.lt.s32.totalorder %s1743_s12, %s1550_s22 }
 0x13d   :  { %p1557_p1 = por %p1556_p0, %p1555_p13 }
 0x13f   :  { %p1558_p2 = pnand %p1557_p1, %p1551_p12 }
 0x141   :  { %1561 = shalt.err (!%p1558_p2)  }
 0x142   :  { %237 = dma.hbm_to_vmem [thread:$0]  %s224_s20, 16, %s235_s9, [#allocation3 + $0xd] }
 0x143   :  { %s1129_s23 = sshll.u32 %s1932_s11, 4  ;;  %s1684_s25 = smov [#allocation2 + $0xf]  }
 0x144   :  { %s266_s29 = sshll.u32 %s1684_s25, 4  ;;  %s240_s28 = scalar_lea.hbm %s1991_s1, %s1129_s23  ;;  %s1952_s29 = int_to_ptr.vmem [resolvable:$true] %s266_s29 }
 0x145   :  { %s1562_s24 = scalar_lea.hbm %s240_s28, 16  ;;  %p1565_p4 = scmp.lt.u32.totalorder %s240_s28, %s1991_s1 }
 0x146   :  { %p1563_p3 = scmp.ne.s32.totalorder %s240_s28, %s1562_s24  ;;  %p1566_p5 = scmp.lt.u32.totalorder %s1734_s8, %s1562_s24 }
 0x147   :  { %p1568_p7 = scmp.lt.u32.totalorder %s1562_s24, %s240_s28 }
 0x148   :  { %p1567_p6 = por %p1566_p5, %p1565_p4 }
 0x14a   :  { %p1569_p8 = por %p1568_p7, %p1567_p6 }
 0x14c   :  { %p1570_p9 = pnand %p1569_p8, %p1563_p3 }
 0x14e   :  { %1573 = shalt.err (!%p1570_p9)  }
 0x14f   :  { %s1574_s6 = scalar_lea.vmem %s1937_s13, 16  ;;  %p1579_p11 = scmp.lt.s32.totalorder %s1937_s13, %s1717_s21 }
 0x150   :  { %p1575_p10 = scmp.ne.s32.totalorder %s1937_s13, %s1574_s6  ;;  %p1580_p12 = scmp.lt.s32.totalorder %s1743_s12, %s1574_s6 }
 0x152   :  { %p1581_p13 = por %p1580_p12, %p1579_p11 }
 0x154   :  { %p1582_p0 = pnand %p1581_p13, %p1575_p10 }
 0x156   :  { %1585 = shalt.err (!%p1582_p0)  }
 0x157   :  { %253 = dma.hbm_to_vmem [thread:$0]  %s240_s28, 16, %s1937_s13, [#allocation3 + $0xe] }
 0x158   :  { %s1131_s7 = sshll.u32 %s1934_s10, 4 }
 0x159   :  { %s256_s9 = scalar_lea.hbm %s1991_s1, %s1131_s7 }
 0x15a   :  { %s1586_s11 = scalar_lea.hbm %s256_s9, 16  ;;  %p1589_p2 = scmp.lt.u32.totalorder %s256_s9, %s1991_s1 }
 0x15b   :  { %p1587_p1 = scmp.ne.s32.totalorder %s256_s9, %s1586_s11  ;;  %p1590_p3 = scmp.lt.u32.totalorder %s1734_s8, %s1586_s11 }
 0x15c   :  { %p1592_p5 = scmp.lt.u32.totalorder %s1586_s11, %s256_s9 }
 0x15d   :  { %p1591_p4 = por %p1590_p3, %p1589_p2 }
 0x15f   :  { %p1593_p6 = por %p1592_p5, %p1591_p4 }
 0x161   :  { %p1594_p7 = pnand %p1593_p6, %p1587_p1 }
 0x163   :  { %1597 = shalt.err (!%p1594_p7)  }
 0x164   :  { %s1598_s13 = scalar_lea.vmem %s1952_s29, 16  ;;  %p1603_p9 = scmp.lt.s32.totalorder %s1952_s29, %s1717_s21 }
 0x165   :  { %p1599_p8 = scmp.ne.s32.totalorder %s1952_s29, %s1598_s13  ;;  %p1604_p10 = scmp.lt.s32.totalorder %s1743_s12, %s1598_s13 }
 0x167   :  { %p1605_p11 = por %p1604_p10, %p1603_p9 }
 0x169   :  { %p1606_p12 = pnand %p1605_p11, %p1599_p8 }
 0x16b   :  { %1609 = shalt.err (!%p1606_p12)  }
 0x16c   :  { %269 = dma.hbm_to_vmem [thread:$0]  %s256_s9, 16, %s1952_s29, [#allocation3 + $0xf] }
 0x16d   :  { %1634 = dma.done.wait [#allocation3], 16 }
 0x16e   :  { %1635 = vsyncadd [#allocation3], 4294967280 }
 0x16f   :  { %1636 = dma.done.wait [#allocation3 + $0x1], 16 }
 0x170   :  { %1637 = vsyncadd [#allocation3 + $0x1], 4294967280 }
 0x171   :  { %1638 = dma.done.wait [#allocation3 + $0x2], 16 }
 0x172   :  { %1639 = vsyncadd [#allocation3 + $0x2], 4294967280 }
 0x173   :  { %1640 = dma.done.wait [#allocation3 + $0x3], 16 }
 0x174   :  { %1641 = vsyncadd [#allocation3 + $0x3], 4294967280 }
 0x175   :  { %1642 = dma.done.wait [#allocation3 + $0x4], 16 }
 0x176   :  { %1643 = vsyncadd [#allocation3 + $0x4], 4294967280 }
 0x177   :  { %1644 = dma.done.wait [#allocation3 + $0x5], 16 }
 0x178   :  { %1645 = vsyncadd [#allocation3 + $0x5], 4294967280 }
 0x179   :  { %1646 = dma.done.wait [#allocation3 + $0x6], 16 }
 0x17a   :  { %1647 = vsyncadd [#allocation3 + $0x6], 4294967280 }
 0x17b   :  { %1648 = dma.done.wait [#allocation3 + $0x7], 16 }
 0x17c   :  { %1649 = vsyncadd [#allocation3 + $0x7], 4294967280 }
 0x17d   :  { %1650 = dma.done.wait [#allocation3 + $0x8], 16 }
 0x17e   :  { %1651 = vsyncadd [#allocation3 + $0x8], 4294967280 }
 0x17f   :  { %1652 = dma.done.wait [#allocation3 + $0x9], 16 }
 0x180   :  { %1653 = vsyncadd [#allocation3 + $0x9], 4294967280 }
 0x181   :  { %1654 = dma.done.wait [#allocation3 + $0xa], 16 }
 0x182   :  { %1655 = vsyncadd [#allocation3 + $0xa], 4294967280 }
 0x183   :  { %1656 = dma.done.wait [#allocation3 + $0xb], 16 }
 0x184   :  { %1657 = vsyncadd [#allocation3 + $0xb], 4294967280 }
 0x185   :  { %1658 = dma.done.wait [#allocation3 + $0xc], 16 }
 0x186   :  { %1659 = vsyncadd [#allocation3 + $0xc], 4294967280 }
 0x187   :  { %1660 = dma.done.wait [#allocation3 + $0xd], 16 }
 0x188   :  { %1661 = vsyncadd [#allocation3 + $0xd], 4294967280 }
 0x189   :  { %1662 = dma.done.wait [#allocation3 + $0xe], 16 }
 0x18a   :  { %1663 = vsyncadd [#allocation3 + $0xe], 4294967280 }
 0x18b   :  { %1664 = dma.done.wait [#allocation3 + $0xf], 16 }
 0x18c   :  { %1665 = vsyncadd [#allocation3 + $0xf], 4294967280  ;;  %s1685_s1 = smov [#allocation6]   ;;  %v649_v0 = vld [vmem:[#allocation2] sm:$0xff]  ;;  %v650_v1 = vld [vmem:[#allocation2 + $0x8] sm:$0xff] }
 0x18d   :  { %s660_s21 = sshll.u32 %s1685_s1, 4  ;;  %v651_v2 = vmul.f32 11.313708, %v649_v0  ;;  %v652_v3 = vmul.f32 11.313708, %v650_v1  ;;  %s661_s21 = int_to_ptr.vmem [resolvable:$true] %s660_s21 }
 0x18e   :  { %s1610_s8 = scalar_lea.vmem %s661_s21, 256  ;;  %p1615_p0 = scmp.lt.s32.totalorder %s661_s21, %s661_s21 }
 0x18f   :  { %653 = vst [vmem:[#allocation6] sm:$0xff] %v651_v2  ;;  %654 = vst [vmem:[#allocation6 + $0x8] sm:$0xff] %v652_v3  ;;  %p1611_p13 = scmp.ne.s32.totalorder %s661_s21, %s1610_s8  ;;  %p1616_p1 = scmp.lt.s32.totalorder %s1610_s8, %s1610_s8 }
 0x191   :  { %p1617_p2 = por %p1616_p1, %p1615_p0 }
 0x193   :  { %p1618_p3 = pnand %p1617_p2, %p1611_p13 }
 0x195   :  { %1621 = shalt.err (!%p1618_p3)
}
 0x196   :  { %s1622_s15 = scalar_lea.hbm %s1992_s2, 256 }
 0x197   :  { %p1623_p4 = scmp.ne.s32.totalorder %s1992_s2, %s1622_s15  ;;  %p1626_p5 = scmp.lt.u32.totalorder %s1622_s15, %s1992_s2 }
 0x199   :  { %p1628_p6 = pnand %p1626_p5, %p1623_p4 }
 0x19b   :  { %1631 = shalt.err (!%p1628_p6)
}
 0x19c   :  { %s1686_s19 = smov 128   ;;  %s1687_s22 = smov 8  }
 0x19d   :  { %666 = dma.vmem_to_hbm [thread:$0]  %s661_s21, 256, %s1992_s2, [#allocation7], %s1686_s19, %s1686_s19, %s1687_s22  }
 0x19e   :  { %1666 = dma.done.wait [#allocation7], 256  }
 0x19f   :  { %1667 = vsyncadd [#allocation7], 4294967040 }
 0x1a0   :  { %670 = vsyncpa [#allocation7], 1 }
 0x1a1   :  { %671 = vsyncmov [#allocation3] }
 0x1a4   :  { %s672_s29 = vpop.sfrf %671 }
 0x1a5   :  { %p1164_p7 = scmp.ne.s32.totalorder %s672_s29, 0 }
 0x1a7   :  { %676 = shalt.err (%p1164_p7)  }
 0x1a8   :  { %678 = vsyncmov [#allocation3 + $0x1] }
 0x1ab   :  { %s679_s30 = vpop.sfrf %678 }
 0x1ac   :  { %p1165_p8 = scmp.ne.s32.totalorder %s679_s30, 0 }
 0x1ae   :  { %683 = shalt.err (%p1165_p8)  }
 0x1af   :  { %685 = vsyncmov [#allocation3 + $0x2] }
 0x1b2   :  { %s686_s26 = vpop.sfrf %685 }
 0x1b3   :  { %p1166_p9 = scmp.ne.s32.totalorder %s686_s26, 0 }
 0x1b5   :  { %690 = shalt.err (%p1166_p9)  }
 0x1b6   :  { %692 = vsyncmov [#allocation3 + $0x3] }
 0x1b9   :  { %s693_s28 = vpop.sfrf %692 }
 0x1ba   :  { %p1167_p10 = scmp.ne.s32.totalorder %s693_s28, 0 }
 0x1bc   :  { %697 = shalt.err (%p1167_p10)  }
 0x1bd   :  { %699 = vsyncmov [#allocation3 + $0x4] }
 0x1c0   :  { %s700_s2 = vpop.sfrf %699 }
 0x1c1   :  { %p1168_p11 = scmp.ne.s32.totalorder %s700_s2, 0 }
 0x1c3   :  { %704 = shalt.err (%p1168_p11)  }
 0x1c4   :  { %706 = vsyncmov [#allocation3 + $0x5] }
 0x1c7   :  { %s707_s24 = vpop.sfrf %706 }
 0x1c8   :  { %p1169_p12 = scmp.ne.s32.totalorder %s707_s24, 0 }
 0x1ca   :  { %711 = shalt.err (%p1169_p12)  }
 0x1cb   :  { %713 = vsyncmov [#allocation3 + $0x6] }
 0x1ce   :  { %s714_s3 = vpop.sfrf %713 }
 0x1cf   :  { %p1170_p13 = scmp.ne.s32.totalorder %s714_s3, 0 }
 0x1d1   :  { %718 = shalt.err (%p1170_p13)  }
 0x1d2   :  { %720 = vsyncmov [#allocation3 + $0x7] }
 0x1d5   :  { %s721_s4 = vpop.sfrf %720 }
 0x1d6   :  { %p1171_p0 = scmp.ne.s32.totalorder %s721_s4, 0 }
 0x1d8   :  { %725 = shalt.err (%p1171_p0)  }
 0x1d9   :  { %727 = vsyncmov [#allocation3 + $0x8] }
 0x1dc   :  { %s728_s6 = vpop.sfrf %727 }
 0x1dd   :  { %p1172_p1 = scmp.ne.s32.totalorder %s728_s6, 0 }
 0x1df   :  { %732 = shalt.err (%p1172_p1)  }
 0x1e0   :  { %734 = vsyncmov [#allocation3 + $0x9] }
 0x1e3   :  { %s735_s7 = vpop.sfrf %734 }
 0x1e4   :  { %p1173_p2 = scmp.ne.s32.totalorder %s735_s7, 0 }
 0x1e6   :  { %739 = shalt.err (%p1173_p2)  }
 0x1e7   :  { %741 = vsyncmov [#allocation3 + $0xa] }
 0x1ea   :  { %s742_s5 = vpop.sfrf %741 }
 0x1eb   :  { %p1174_p3 = scmp.ne.s32.totalorder %s742_s5, 0 }
 0x1ed   :  { %746 = shalt.err (%p1174_p3)  }
 0x1ee   :  { %748 = vsyncmov [#allocation3 + $0xb] }
 0x1f1   :  { %s749_s27 = vpop.sfrf %748 }
 0x1f2   :  { %p1175_p4 = scmp.ne.s32.totalorder %s749_s27, 0 }
 0x1f4   :  { %753 = shalt.err (%p1175_p4)  }
 0x1f5   :  { %755 = vsyncmov [#allocation3 + $0xc] }
 0x1f8   :  { %s756_s9 = vpop.sfrf %755 }
 0x1f9   :  { %p1176_p5 = scmp.ne.s32.totalorder %s756_s9, 0 }
 0x1fb   :  { %760 = shalt.err (%p1176_p5)  }
 0x1fc   :  { %762 = vsyncmov [#allocation3 + $0xd] }
 0x1ff   :  { %s763_s11 = vpop.sfrf %762 }
 0x200   :  { %p1177_p6 = scmp.ne.s32.totalorder %s763_s11, 0 }
 0x202   :  { %767 = shalt.err (%p1177_p6)  }
 0x203   :  { %769 = vsyncmov [#allocation3 + $0xe] }
 0x206   :  { %s770_s0 = vpop.sfrf %769 }
 0x207   :  { %p1178_p7 = scmp.ne.s32.totalorder %s770_s0, 0 }
 0x209   :  { %774 = shalt.err (%p1178_p7)  }
 0x20a   :  { %776 = vsyncmov [#allocation3 + $0xf] }
 0x20d   :  { %s777_s14 = vpop.sfrf %776 }
 0x20e   :  { %p1179_p8 = scmp.ne.s32.totalorder %s777_s14, 0 }
 0x210   :  { %781 = shalt.err (%p1179_p8)  }
 0x211   :  { %783 = vsyncmov [#allocation3 + $0x10] }
 0x214   :  { %s784_s13 = vpop.sfrf %783 }
 0x215   :  { %p1180_p9 = scmp.ne.s32.totalorder %s784_s13, 0 }
 0x217   :  { %788 = shalt.err (%p1180_p9)  }
 0x218   :  { %790 = vsyncmov [#allocation3 + $0x11] }
 0x21b   :  { %s791_s1 = vpop.sfrf %790 }
 0x21c   :  { %p1181_p10 = scmp.ne.s32.totalorder %s791_s1, 0 }
 0x21e   :  { %795 = shalt.err (%p1181_p10)  }
 0x21f   :  { %797 = vsyncmov [#allocation3 + $0x12] }
 0x222   :  { %s798_s21 = vpop.sfrf %797 }
 0x223   :  { %p1182_p11 = scmp.ne.s32.totalorder %s798_s21, 0 }
 0x225   :  { %802 = shalt.err (%p1182_p11)  }
 0x226   :  { %804 = vsyncmov [#allocation3 + $0x13] }
 0x229   :  { %s805_s8 = vpop.sfrf %804 }
 0x22a   :  { %p1183_p12 = scmp.ne.s32.totalorder %s805_s8, 0 }
 0x22c   :  { %809 = shalt.err (%p1183_p12)  }
 0x22d   :  { %811 = vsyncmov [#allocation3 + $0x14] }
 0x230   :  { %s812_s12 = vpop.sfrf %811 }
 0x231   :  { %p1184_p13 = scmp.ne.s32.totalorder %s812_s12, 0 }
 0x233   :  { %816 = shalt.err (%p1184_p13)  }
 0x234   :  { %818 = vsyncmov [#allocation3 + $0x15] }
 0x237   :  { %s819_s10 = vpop.sfrf %818 }
 0x238   :  { %p1185_p0 = scmp.ne.s32.totalorder %s819_s10, 0 }
 0x23a   :  { %823 = shalt.err (%p1185_p0)  }
 0x23b   :  { %825 = vsyncmov [#allocation3 + $0x16] }
 0x23e   :  { %s826_s15 = vpop.sfrf %825 }
 0x23f   :  { %p1186_p1 = scmp.ne.s32.totalorder %s826_s15, 0 }
 0x241   :  { %830 = shalt.err (%p1186_p1)  }
 0x242   :  { %832 = vsyncmov [#allocation3 + $0x17] }
 0x245   :  { %s833_s16 = vpop.sfrf %832 }
 0x246   :  { %p1187_p2 = scmp.ne.s32.totalorder %s833_s16, 0 }
 0x248   :  { %837 = shalt.err (%p1187_p2)  }
 0x249   :  { %839 = vsyncmov [#allocation3 + $0x18] }
 0x24c   :  { %s840_s20 = vpop.sfrf %839 }
 0x24d   :  { %p1188_p3 = scmp.ne.s32.totalorder %s840_s20, 0 }
 0x24f   :  { %844 = shalt.err (%p1188_p3)  }
 0x250   :  { %846 = vsyncmov [#allocation3 + $0x19] }
 0x253   :  { %s847_s17 = vpop.sfrf %846 }
 0x254   :  { %p1189_p4 = scmp.ne.s32.totalorder %s847_s17, 0 }
 0x256   :  { %851 = shalt.err (%p1189_p4)  }
 0x257   :  { %853 = vsyncmov [#allocation3 + $0x1a] }
 0x25a   :  { %s854_s18 = vpop.sfrf %853 }
 0x25b   :  { %p1190_p5 = scmp.ne.s32.totalorder %s854_s18, 0 }
 0x25d   :  { %858 = shalt.err (%p1190_p5)  }
 0x25e   :  { %860 = vsyncmov [#allocation3 + $0x1b] }
 0x261   :  { %s861_s19 = vpop.sfrf %860 }
 0x262   :  { %p1191_p6 = scmp.ne.s32.totalorder %s861_s19, 0 }
 0x264   :  { %865 = shalt.err (%p1191_p6)  }
 0x265   :  { %867 = vsyncmov [#allocation3 + $0x1c] }
 0x268   :  { %s868_s22 = vpop.sfrf %867 }
 0x269   :  { %p1192_p7 = scmp.ne.s32.totalorder %s868_s22, 0 }
 0x26b   :  { %872 = shalt.err (%p1192_p7)  }
 0x26c   :  { %874 = vsyncmov [#allocation3 + $0x1d] }
 0x26f   :  { %s875_s23 = vpop.sfrf %874 }
 0x270   :  { %p1193_p8 = scmp.ne.s32.totalorder %s875_s23, 0 }
 0x272   :  { %879 = shalt.err (%p1193_p8)  }
 0x273   :  { %881 = vsyncmov [#allocation3 + $0x1e] }
 0x276   :  { %s882_s25 = vpop.sfrf %881 }
 0x277   :  { %p1194_p9 = scmp.ne.s32.totalorder %s882_s25, 0 }
 0x279   :  { %886 = shalt.err (%p1194_p9)  }
 0x27a   :  { %888 = vsyncmov [#allocation3 + $0x1f] }
 0x27d   :  { %s889_s29 = vpop.sfrf %888 }
 0x27e   :  { %p1195_p10 = scmp.ne.s32.totalorder %s889_s29, 0 }
 0x280   :  { %893 = shalt.err (%p1195_p10)  }

</bundles_post_ra>
